<compile_context>
chip_gen: v6e
topology: v6e:2x2x1
jax: 0.10.0
libtpu: 0.0.40
codegen_flags: <defaults>
</compile_context>

<pallas_src>
import jax
import jax.numpy as jnp
from jax import lax
from jax.experimental import pallas as pl
from jax.experimental.pallas import tpu as pltpu


def _encoder_bigru_kernel(ids_ref, emb_hbm, h0_ref, wih_ref, bih_ref,
                          whh_ref, bhhn_ref, out_ref, hn_ref,
                          x_vmem, gx_ref, sem):
    T = out_ref.shape[0]
    H2 = h0_ref.shape[1]          # 2H
    H = H2 // 2

    # ---- Fused embedding gather: DMA each table row HBM -> VMEM. ------------
    # Issue all row copies first, then wait for all of them (the DMAs overlap).
    @pl.loop(0, T)
    def _issue(t):
        row = ids_ref[t]
        pltpu.make_async_copy(emb_hbm.at[pl.ds(row, 1), :],
                              x_vmem.at[pl.ds(t, 1), :],
                              sem.at[t]).start()

    @pl.loop(0, T)
    def _wait(t):
        pltpu.make_async_copy(emb_hbm.at[pl.ds(ids_ref[t], 1), :],
                              x_vmem.at[pl.ds(t, 1), :],
                              sem.at[t]).wait()

    # ---- Fused input projection for BOTH directions / ALL gates -------------
    # Dense (T,H)x(H,6H): no zero-block MACs, half the activation DMA bytes
    # vs. the previous block-diagonal layout.  Biases (with b_hh folded for
    # r/z) are added once.  Stored to VMEM scratch so the per-step access is a
    # cheap dynamic row load.
    gx_ref[...] = (jnp.dot(x_vmem[...], wih_ref[...],
                           preferred_element_type=jnp.float32)
                   + bih_ref[...])

    bhh_n = bhhn_ref[...]                                 # (1, 2H), tiny, hoisted

    # Column-direction mask: columns are [r_f|r_b|z_f|z_b|n_f|n_b] (H each);
    # even H-blocks belong to the forward direction.
    col = lax.broadcasted_iota(jnp.int32, (1, 6 * H), 1)
    fwd_col = (col % (2 * H)) < H

    def step(i, h):               # h: (1, 2H) = [h_f | h_b]
        # Forward consumes x[i]; backward consumes x[T-1-i].  Merge the two
        # projected rows with a per-column select (VPU, off the MXU path).
        gx_f = gx_ref[pl.ds(i, 1), :]                     # (1, 6H)
        gx_b = gx_ref[pl.ds(T - 1 - i, 1), :]             # (1, 6H)
        gx_t = jnp.where(fwd_col, gx_f, gx_b)

        # whh read from VMEM each step (vld slots are idle in this regime;
        # avoids pinning/spilling the block for the whole loop at large H).
        gh = jnp.dot(h, whh_ref[...], preferred_element_type=jnp.float32)

        rz = jax.nn.sigmoid(gx_t[:, 0:4 * H] + gh[:, 0:4 * H])
        r = rz[:, 0:2 * H]
        z = rz[:, 2 * H:4 * H]
        n = jnp.tanh(gx_t[:, 4 * H:6 * H] + r * (gh[:, 4 * H:6 * H] + bhh_n))
        h_new = n + z * (h - n)

        hv = h_new.astype(out_ref.dtype)
        # In-kernel un-reverse of the backward direction: forward state goes to
        # row i, backward state to row T-1-i, so the output leaves the kernel
        # already in time order (no wrapper-side reversal HBM pass).
        out_ref[pl.ds(i, 1), pl.ds(0, H)] = hv[:, 0:H]
        out_ref[pl.ds(T - 1 - i, 1), pl.ds(H, H)] = hv[:, H:2 * H]
        return h_new

    # Full unroll for short sequences; partial unroll otherwise so the LLO
    # scheduler can overlap row loads / output stores across iterations.
    unroll = True if T <= 32 else 8
    h_final = lax.fori_loop(0, T, step, h0_ref[...], unroll=unroll)
    hn_ref[...] = h_final.astype(hn_ref.dtype)


def encoder_bigru_pallas(ids, h0_cat, embedding, packed):
    """ids: (T,) int32; h0_cat: (1, 2H) f32; embedding: (V, H) f32.

    Returns (out (T, 2H) in time order, hn (1, 2H))."""
    T = ids.shape[0]
    H2 = h0_cat.shape[1]
    H = H2 // 2
    vmem = pl.BlockSpec(memory_space=pltpu.MemorySpace.VMEM)
    smem = pl.BlockSpec(memory_space=pltpu.MemorySpace.SMEM)
    hbm = pl.BlockSpec(memory_space=pl.ANY)

    out_shape = (
        jax.ShapeDtypeStruct((T, 2 * H), jnp.float32),
        jax.ShapeDtypeStruct((1, 2 * H), jnp.float32),
    )
    return pl.pallas_call(
        _encoder_bigru_kernel,
        out_shape=out_shape,
        in_specs=[smem, hbm, vmem, vmem, vmem, vmem, vmem],
        out_specs=(vmem, vmem),
        scratch_shapes=[
            pltpu.VMEM((T, H), jnp.float32),       # gathered embeddings
            pltpu.VMEM((T, 6 * H), jnp.float32),   # fused input projection
            pltpu.SemaphoreType.DMA((T,)),         # one sem per gathered row
        ],
    )(ids, embedding, h0_cat,
      packed["wih_dense"], packed["bih"],
      packed["whh_block"], packed["bhh_n"])


def _pack_bigru_params(p, H):
    """Pack per-direction PyTorch-style GRU params into the fused layout."""
    def gates(w):                 # (H, 3H) -> r, z, n each (H, H)
        return w[:, 0:H], w[:, H:2 * H], w[:, 2 * H:3 * H]

    # Dense input-projection weight (H, 6H): same input row feeds both
    # directions; columns [r_f|r_b|z_f|z_b|n_f|n_b].
    rf, zf, nf = gates(p["wih_f"])
    rb, zb, nb = gates(p["wih_b"])
    wih_dense = jnp.concatenate([rf, rb, zf, zb, nf, nb], axis=1)

    # Hidden->gates weight stays block-diagonal over packed h = [h_f | h_b].
    Z = jnp.zeros((H, H), jnp.float32)
    rfh, zfh, nfh = gates(p["whh_f"])
    rbh, zbh, nbh = gates(p["whh_b"])
    top = jnp.concatenate([rfh, Z, zfh, Z, nfh, Z], axis=1)   # rows <- h_f
    bot = jnp.concatenate([Z, rbh, Z, zbh, Z, nbh], axis=1)   # rows <- h_b
    whh_block = jnp.concatenate([top, bot], axis=0)           # (2H, 6H)

    def gate(b, g):               # b: (1, 3H)
        return b[:, g * H:(g + 1) * H]

    bih = jnp.concatenate([
        gate(p["bih_f"], 0) + gate(p["bhh_f"], 0),   # r_f (b_hh folded)
        gate(p["bih_b"], 0) + gate(p["bhh_b"], 0),   # r_b
        gate(p["bih_f"], 1) + gate(p["bhh_f"], 1),   # z_f
        gate(p["bih_b"], 1) + gate(p["bhh_b"], 1),   # z_b
        gate(p["bih_f"], 2),                         # n_f (b_hh_n stays separate)
        gate(p["bih_b"], 2),                         # n_b
    ], axis=1)                                       # (1, 6H)
    bhh_n = jnp.concatenate([gate(p["bhh_f"], 2), gate(p["bhh_b"], 2)], axis=1)

    return {"wih_dense": wih_dense, "whh_block": whh_block,
            "bih": bih, "bhh_n": bhh_n}


class EncoderRNNPallas:
    """JAX/Pallas port of the PyTorch EncoderRNN (embedding + bi-GRU)."""

    def __init__(self, input_size, hidden_size, key):
        self.hidden_size = hidden_size
        H = hidden_size
        k = 1.0 / jnp.sqrt(jnp.float32(H))
        keys = jax.random.split(key, 10)

        def u(kk, shape):
            return jax.random.uniform(kk, shape, jnp.float32, -k, k)

        # Embedding table, N(0, 1) like nn.Embedding default.
        self.embedding = jax.random.normal(keys[0], (input_size, H), jnp.float32)

        # GRU weights: PyTorch stores (3H, H); kept transposed (H, 3H), [r|z|n].
        self.params = {
            "wih_f": u(keys[1], (H, 3 * H)),
            "whh_f": u(keys[2], (H, 3 * H)),
            "bih_f": u(keys[3], (1, 3 * H)),
            "bhh_f": u(keys[4], (1, 3 * H)),
            "wih_b": u(keys[5], (H, 3 * H)),
            "whh_b": u(keys[6], (H, 3 * H)),
            "bih_b": u(keys[7], (1, 3 * H)),
            "bhh_b": u(keys[8], (1, 3 * H)),
        }
        self.packed = _pack_bigru_params(self.params, H)

    def init_hidden(self):
        return jnp.zeros((2, 1, self.hidden_size), jnp.float32)

    def __call__(self, input_ids, hidden):
        H = self.hidden_size
        # embedded = embedding(input).view(-1, 1, H) -> time-major, batch=1.
        ids = jnp.reshape(input_ids, (-1,)).astype(jnp.int32)
        T = ids.shape[0]
        h0 = jnp.reshape(hidden, (1, 2 * H))                 # [h_f | h_b]

        out2d, hn_flat = encoder_bigru_pallas(ids, h0, self.embedding, self.packed)

        output = out2d.reshape(T, 1, 2 * H)   # (seq, batch=1, 2*H), time order
        hn = hn_flat.reshape(2, 1, H)         # (num_dirs, batch=1, H)
        return output, hn


def _bigru_reference(emb, h0, params):
    """Pure-JAX reference matching PyTorch bidirectional GRU semantics."""
    T, H = emb.shape

    def direction(x_seq, h, wih, whh, bih, bhh):
        outs = []
        for t in range(T):
            gx = x_seq[t:t + 1] @ wih + bih
            gh = h @ whh + bhh
            r = jax.nn.sigmoid(gx[:, 0:H] + gh[:, 0:H])
            z = jax.nn.sigmoid(gx[:, H:2 * H] + gh[:, H:2 * H])
            n = jnp.tanh(gx[:, 2 * H:3 * H] + r * gh[:, 2 * H:3 * H])
            h = (1.0 - z) * n + z * h
            outs.append(h)
        return jnp.concatenate(outs, axis=0), h

    of, hf = direction(emb, h0[0:1],
                       params["wih_f"], params["whh_f"],
                       params["bih_f"], params["bhh_f"])
    ob_rev, hb = direction(emb[::-1], h0[1:2],
                           params["wih_b"], params["whh_b"],
                           params["bih_b"], params["bhh_b"])
    out = jnp.concatenate([of, ob_rev[::-1]], axis=-1)   # (T, 2H)
    hn = jnp.concatenate([hf, hb], axis=0)               # (2, H)
    return out, hn


if __name__ == "__main__":
    key = jax.random.PRNGKey(0)
    key_model, key_ids = jax.random.split(key)

    input_size = 50    # vocab
    hidden_size = 32
    seq_len = 8

    enc = EncoderRNNPallas(input_size, hidden_size, key_model)
    input_ids = jax.random.randint(key_ids, (seq_len,), 0, input_size)
    hidden = enc.init_hidden()

    output, hn = enc(input_ids, hidden)
    output = jax.block_until_ready(output)
    hn = jax.block_until_ready(hn)

    assert output.shape == (seq_len, 1, 2 * hidden_size)
    assert hn.shape == (2, 1, hidden_size)
    assert bool(jnp.all(jnp.isfinite(output))) and bool(jnp.all(jnp.isfinite(hn)))

    # Correctness check against a pure-JAX reference GRU (also checks the
    # in-kernel embedding gather against jnp.take).
    emb = jnp.take(enc.embedding, jnp.reshape(input_ids, (-1,)), axis=0)
    ref_out, ref_hn = _bigru_reference(emb, jnp.reshape(hidden, (2, hidden_size)),
                                       enc.params)
    assert jnp.allclose(output.reshape(seq_len, 2 * hidden_size), ref_out,
                        atol=1e-3, rtol=1e-3)
    assert jnp.allclose(hn.reshape(2, hidden_size), ref_hn, atol=1e-3, rtol=1e-3)

    print("KERNEL_OK")
</pallas_src>

<mosaic_0001>
module attributes {stable_mosaic.version = 11 : i64} {
  func.func @_encoder_bigru_kernel(%arg0: memref<8xi32, #tpu.memory_space<smem>>, %arg1: memref<50x32xf32, #tpu.memory_space<any>>, %arg2: memref<1x64xf32, #tpu.memory_space<vmem>>, %arg3: memref<32x192xf32, #tpu.memory_space<vmem>>, %arg4: memref<1x192xf32, #tpu.memory_space<vmem>>, %arg5: memref<64x192xf32, #tpu.memory_space<vmem>>, %arg6: memref<1x64xf32, #tpu.memory_space<vmem>>, %arg7: memref<8x64xf32, #tpu.memory_space<vmem>>, %arg8: memref<1x64xf32, #tpu.memory_space<vmem>>, %arg9: memref<8x32xf32, #tpu.memory_space<vmem>>, %arg10: memref<8x192xf32, #tpu.memory_space<vmem>>, %arg11: memref<8x!tpu.dma_semaphore, #tpu.memory_space<semaphore_mem>>) attributes {dimension_semantics = [], scalar_prefetch = 0 : i64, scratch_operands = 3 : i64, tpu.core_type = #tpu.core_type<tc>} {
    %c0_i32 = arith.constant 0 : i32
    %c8_i32 = arith.constant 8 : i32
    %0 = arith.addi %c0_i32, %c8_i32 : i32
    %c1_i32 = arith.constant 1 : i32
    scf.for %arg12 = %c0_i32 to %0 step %c1_i32  : i32 {
      %c1_i32_105 = arith.constant 1 : i32
      %303 = arith.muli %arg12, %c1_i32_105 : i32
      %c0_i32_106 = arith.constant 0 : i32
      %304 = arith.addi %c0_i32_106, %303 : i32
      %305 = arith.index_cast %304 : i32 to index
      %306 = memref.load %arg0[%305] : memref<8xi32, #tpu.memory_space<smem>>
      %c0_i32_107 = arith.constant 0 : i32
      %307 = tpu.memref_slice %arg1[%306, %c0_i32_107] : memref<50x32xf32, #tpu.memory_space<any>> -> memref<1x32xf32, #tpu.memory_space<any>>
      %c0_i32_108 = arith.constant 0 : i32
      %308 = tpu.memref_slice %arg9[%304, %c0_i32_108] : memref<8x32xf32, #tpu.memory_space<vmem>> -> memref<1x32xf32, #tpu.memory_space<vmem>>
      %309 = tpu.memref_slice %arg11[%304] : memref<8x!tpu.dma_semaphore, #tpu.memory_space<semaphore_mem>> -> memref<1x!tpu.dma_semaphore, #tpu.memory_space<semaphore_mem>>
      %310 = tpu.memref_squeeze %309 : memref<1x!tpu.dma_semaphore, #tpu.memory_space<semaphore_mem>> -> memref<!tpu.dma_semaphore, #tpu.memory_space<semaphore_mem>>
      tpu.enqueue_dma source(%307 : memref<1x32xf32, #tpu.memory_space<any>>) target(%308 : memref<1x32xf32, #tpu.memory_space<vmem>>) target_semaphore(%310 : memref<!tpu.dma_semaphore, #tpu.memory_space<semaphore_mem>>)
    }
    %c8_i32_0 = arith.constant 8 : i32
    %c0_i32_1 = arith.constant 0 : i32
    %c8_i32_2 = arith.constant 8 : i32
    %1 = arith.addi %c0_i32_1, %c8_i32_2 : i32
    %c1_i32_3 = arith.constant 1 : i32
    scf.for %arg12 = %c0_i32_1 to %1 step %c1_i32_3  : i32 {
      %c1_i32_105 = arith.constant 1 : i32
      %303 = arith.muli %arg12, %c1_i32_105 : i32
      %c0_i32_106 = arith.constant 0 : i32
      %304 = arith.addi %c0_i32_106, %303 : i32
      %305 = arith.index_cast %304 : i32 to index
      %306 = memref.load %arg0[%305] : memref<8xi32, #tpu.memory_space<smem>>
      %c0_i32_107 = arith.constant 0 : i32
      %307 = tpu.memref_slice %arg1[%306, %c0_i32_107] : memref<50x32xf32, #tpu.memory_space<any>> -> memref<1x32xf32, #tpu.memory_space<any>>
      %c0_i32_108 = arith.constant 0 : i32
      %308 = tpu.memref_slice %arg9[%304, %c0_i32_108] : memref<8x32xf32, #tpu.memory_space<vmem>> -> memref<1x32xf32, #tpu.memory_space<vmem>>
      %309 = tpu.memref_slice %arg11[%304] : memref<8x!tpu.dma_semaphore, #tpu.memory_space<semaphore_mem>> -> memref<1x!tpu.dma_semaphore, #tpu.memory_space<semaphore_mem>>
      %310 = tpu.memref_squeeze %309 : memref<1x!tpu.dma_semaphore, #tpu.memory_space<semaphore_mem>> -> memref<!tpu.dma_semaphore, #tpu.memory_space<semaphore_mem>>
      tpu.wait_dma2 semaphore(%310 : memref<!tpu.dma_semaphore, #tpu.memory_space<semaphore_mem>>) src(%307 : memref<1x32xf32, #tpu.memory_space<any>>) dst(%308 : memref<1x32xf32, #tpu.memory_space<vmem>>)
    }
    %c8_i32_4 = arith.constant 8 : i32
    %c0 = arith.constant 0 : index
    %c0_5 = arith.constant 0 : index
    %2 = vector.load %arg9[%c0, %c0_5] : memref<8x32xf32, #tpu.memory_space<vmem>>, vector<8x32xf32>
    %c0_6 = arith.constant 0 : index
    %c0_7 = arith.constant 0 : index
    %3 = vector.load %arg3[%c0_6, %c0_7] : memref<32x192xf32, #tpu.memory_space<vmem>>, vector<32x192xf32>
    %cst = arith.constant dense<0.000000e+00> : vector<8x192xf32>
    %4 = tpu.matmul %2, %3, %cst {dimension_numbers = #tpu.dot_dimension_numbers<[1], [0], [0], [1], [0, 0, 1, 1], [], []>} : vector<8x32xf32>, vector<32x192xf32>, vector<8x192xf32> -> vector<8x192xf32>
    %c0_8 = arith.constant 0 : index
    %c0_9 = arith.constant 0 : index
    %5 = vector.load %arg4[%c0_8, %c0_9] : memref<1x192xf32, #tpu.memory_space<vmem>>, vector<1x192xf32>
    %6 = vector.broadcast %5 : vector<1x192xf32> to vector<8x192xf32>
    %7 = arith.addf %4, %6 : vector<8x192xf32>
    %c0_10 = arith.constant 0 : index
    %c0_11 = arith.constant 0 : index
    %8 = vector.load %arg10[%c0_10, %c0_11] : memref<8x192xf32, #tpu.memory_space<vmem>>, vector<8x192xf32>
    tpu.vector_store %arg10[%c0_10, %c0_11], %7 {strides = array<i32>} : memref<8x192xf32, #tpu.memory_space<vmem>>, vector<8x192xf32>,
    %c0_12 = arith.constant 0 : index
    %c0_13 = arith.constant 0 : index
    %9 = vector.load %arg6[%c0_12, %c0_13] : memref<1x64xf32, #tpu.memory_space<vmem>>, vector<1x64xf32>
    %10 = tpu.iota {dimensions = array<i32: 1>} : vector<1x192xi32>
    %c64_i32 = arith.constant 64 : i32
    %c0_i32_14 = arith.constant 0 : i32
    %11 = arith.cmpi eq, %c64_i32, %c0_i32_14 : i32
    %c1_i32_15 = arith.constant 1 : i32
    %12 = arith.select %11, %c1_i32_15, %c64_i32 : i32
    %13 = vector.broadcast %12 : i32 to vector<1x192xi32>
    %14 = arith.remsi %10, %13 : vector<1x192xi32>
    %c0_i32_16 = arith.constant 0 : i32
    %15 = vector.broadcast %c0_i32_16 : i32 to vector<1x192xi32>
    %16 = arith.cmpi ne, %14, %15 : vector<1x192xi32>
    %c0_i32_17 = arith.constant 0 : i32
    %17 = vector.broadcast %c0_i32_17 : i32 to vector<1x192xi32>
    %18 = arith.cmpi slt, %14, %17 : vector<1x192xi32>
    %c0_i32_18 = arith.constant 0 : i32
    %19 = arith.cmpi slt, %12, %c0_i32_18 : i32
    %20 = vector.broadcast %19 : i1 to vector<1x192xi1>
    %21 = vector.broadcast %20 : vector<1x192xi1> to vector<1x192xi1>
    %22 = arith.xori %18, %21 : vector<1x192xi1>
    %23 = arith.andi %22, %16 : vector<1x192xi1>
    %24 = vector.broadcast %12 : i32 to vector<1x192xi32>
    %25 = arith.addi %14, %24 : vector<1x192xi32>
    %26 = arith.select %23, %25, %14 : vector<1x192xi1>, vector<1x192xi32>
    %c32_i32 = arith.constant 32 : i32
    %27 = vector.broadcast %c32_i32 : i32 to vector<1x192xi32>
    %28 = arith.cmpi slt, %26, %27 : vector<1x192xi32>
    %c0_19 = arith.constant 0 : index
    %c0_20 = arith.constant 0 : index
    %29 = vector.load %arg2[%c0_19, %c0_20] : memref<1x64xf32, #tpu.memory_space<vmem>>, vector<1x64xf32>
    %c0_i32_21 = arith.constant 0 : i32
    %30 = arith.index_cast %c0_i32_21 : i32 to index
    %c0_22 = arith.constant 0 : index
    %31 = vector.load %arg10[%30, %c0_22] : memref<8x192xf32, #tpu.memory_space<vmem>>, vector<1x192xf32>
    %c7_i32 = arith.constant 7 : i32
    %32 = arith.subi %c7_i32, %c0_i32_21 : i32
    %33 = arith.index_cast %32 : i32 to index
    %c0_23 = arith.constant 0 : index
    %34 = vector.load %arg10[%33, %c0_23] : memref<8x192xf32, #tpu.memory_space<vmem>>, vector<1x192xf32>
    %35 = arith.select %28, %31, %34 : vector<1x192xi1>, vector<1x192xf32>
    %c0_24 = arith.constant 0 : index
    %c0_25 = arith.constant 0 : index
    %36 = vector.load %arg5[%c0_24, %c0_25] : memref<64x192xf32, #tpu.memory_space<vmem>>, vector<64x192xf32>
    %cst_26 = arith.constant dense<0.000000e+00> : vector<1x192xf32>
    %37 = tpu.matmul %29, %36, %cst_26 {dimension_numbers = #tpu.dot_dimension_numbers<[1], [0], [0], [1], [0, 0, 1, 1], [], []>} : vector<1x64xf32>, vector<64x192xf32>, vector<1x192xf32> -> vector<1x192xf32>
    %38 = vector.extract_strided_slice %35 {offsets = [0, 0], sizes = [1, 128], strides = [1, 1]} : vector<1x192xf32> to vector<1x128xf32>
    %39 = vector.extract_strided_slice %37 {offsets = [0, 0], sizes = [1, 128], strides = [1, 1]} : vector<1x192xf32> to vector<1x128xf32>
    %40 = arith.addf %38, %39 : vector<1x128xf32>
    %41 = arith.negf %40 : vector<1x128xf32>
    %42 = math.exp %41 : vector<1x128xf32>
    %cst_27 = arith.constant 1.000000e+00 : f32
    %43 = vector.broadcast %cst_27 : f32 to vector<1x128xf32>
    %44 = arith.addf %43, %42 : vector<1x128xf32>
    %45 = arith.divf %43, %44 : vector<1x128xf32>
    %46 = vector.extract_strided_slice %45 {offsets = [0, 0], sizes = [1, 64], strides = [1, 1]} : vector<1x128xf32> to vector<1x64xf32>
    %47 = vector.extract_strided_slice %45 {offsets = [0, 64], sizes = [1, 64], strides = [1, 1]} : vector<1x128xf32> to vector<1x64xf32>
    %48 = vector.extract_strided_slice %35 {offsets = [0, 128], sizes = [1, 64], strides = [1, 1]} : vector<1x192xf32> to vector<1x64xf32>
    %49 = vector.extract_strided_slice %37 {offsets = [0, 128], sizes = [1, 64], strides = [1, 1]} : vector<1x192xf32> to vector<1x64xf32>
    %50 = arith.addf %49, %9 : vector<1x64xf32>
    %51 = arith.mulf %46, %50 : vector<1x64xf32>
    %52 = arith.addf %48, %51 : vector<1x64xf32>
    %53 = math.tanh %52 : vector<1x64xf32>
    %54 = arith.subf %29, %53 : vector<1x64xf32>
    %55 = arith.mulf %47, %54 : vector<1x64xf32>
    %56 = arith.addf %53, %55 : vector<1x64xf32>
    %57 = vector.extract_strided_slice %56 {offsets = [0, 0], sizes = [1, 32], strides = [1, 1]} : vector<1x64xf32> to vector<1x32xf32>
    %58 = arith.index_cast %c0_i32_21 : i32 to index
    %c0_28 = arith.constant 0 : index
    %59 = vector.load %arg7[%58, %c0_28] : memref<8x64xf32, #tpu.memory_space<vmem>>, vector<1x32xf32>
    tpu.vector_store %arg7[%58, %c0_28], %57 {strides = array<i32>} : memref<8x64xf32, #tpu.memory_space<vmem>>, vector<1x32xf32>,
    %60 = vector.extract_strided_slice %56 {offsets = [0, 32], sizes = [1, 32], strides = [1, 1]} : vector<1x64xf32> to vector<1x32xf32>
    %c7_i32_29 = arith.constant 7 : i32
    %61 = arith.subi %c7_i32_29, %c0_i32_21 : i32
    %62 = arith.index_cast %61 : i32 to index
    %c32 = arith.constant 32 : index
    %63 = vector.load %arg7[%62, %c32] : memref<8x64xf32, #tpu.memory_space<vmem>>, vector<1x32xf32>
    tpu.vector_store %arg7[%62, %c32], %60 {strides = array<i32>} : memref<8x64xf32, #tpu.memory_space<vmem>>, vector<1x32xf32>,
    %c1_i32_30 = arith.constant 1 : i32
    %64 = arith.index_cast %c1_i32_30 : i32 to index
    %c0_31 = arith.constant 0 : index
    %65 = vector.load %arg10[%64, %c0_31] : memref<8x192xf32, #tpu.memory_space<vmem>>, vector<1x192xf32>
    %c7_i32_32 = arith.constant 7 : i32
    %66 = arith.subi %c7_i32_32, %c1_i32_30 : i32
    %67 = arith.index_cast %66 : i32 to index
    %c0_33 = arith.constant 0 : index
    %68 = vector.load %arg10[%67, %c0_33] : memref<8x192xf32, #tpu.memory_space<vmem>>, vector<1x192xf32>
    %69 = arith.select %28, %65, %68 : vector<1x192xi1>, vector<1x192xf32>
    %c0_34 = arith.constant 0 : index
    %c0_35 = arith.constant 0 : index
    %70 = vector.load %arg5[%c0_34, %c0_35] : memref<64x192xf32, #tpu.memory_space<vmem>>, vector<64x192xf32>
    %cst_36 = arith.constant dense<0.000000e+00> : vector<1x192xf32>
    %71 = tpu.matmul %56, %70, %cst_36 {dimension_numbers = #tpu.dot_dimension_numbers<[1], [0], [0], [1], [0, 0, 1, 1], [], []>} : vector<1x64xf32>, vector<64x192xf32>, vector<1x192xf32> -> vector<1x192xf32>
    %72 = vector.extract_strided_slice %69 {offsets = [0, 0], sizes = [1, 128], strides = [1, 1]} : vector<1x192xf32> to vector<1x128xf32>
    %73 = vector.extract_strided_slice %71 {offsets = [0, 0], sizes = [1, 128], strides = [1, 1]} : vector<1x192xf32> to vector<1x128xf32>
    %74 = arith.addf %72, %73 : vector<1x128xf32>
    %75 = arith.negf %74 : vector<1x128xf32>
    %76 = math.exp %75 : vector<1x128xf32>
    %cst_37 = arith.constant 1.000000e+00 : f32
    %77 = vector.broadcast %cst_37 : f32 to vector<1x128xf32>
    %78 = arith.addf %77, %76 : vector<1x128xf32>
    %79 = arith.divf %77, %78 : vector<1x128xf32>
    %80 = vector.extract_strided_slice %79 {offsets = [0, 0], sizes = [1, 64], strides = [1, 1]} : vector<1x128xf32> to vector<1x64xf32>
    %81 = vector.extract_strided_slice %79 {offsets = [0, 64], sizes = [1, 64], strides = [1, 1]} : vector<1x128xf32> to vector<1x64xf32>
    %82 = vector.extract_strided_slice %69 {offsets = [0, 128], sizes = [1, 64], strides = [1, 1]} : vector<1x192xf32> to vector<1x64xf32>
    %83 = vector.extract_strided_slice %71 {offsets = [0, 128], sizes = [1, 64], strides = [1, 1]} : vector<1x192xf32> to vector<1x64xf32>
    %84 = arith.addf %83, %9 : vector<1x64xf32>
    %85 = arith.mulf %80, %84 : vector<1x64xf32>
    %86 = arith.addf %82, %85 : vector<1x64xf32>
    %87 = math.tanh %86 : vector<1x64xf32>
    %88 = arith.subf %56, %87 : vector<1x64xf32>
    %89 = arith.mulf %81, %88 : vector<1x64xf32>
    %90 = arith.addf %87, %89 : vector<1x64xf32>
    %91 = vector.extract_strided_slice %90 {offsets = [0, 0], sizes = [1, 32], strides = [1, 1]} : vector<1x64xf32> to vector<1x32xf32>
    %92 = arith.index_cast %c1_i32_30 : i32 to index
    %c0_38 = arith.constant 0 : index
    %93 = vector.load %arg7[%92, %c0_38] : memref<8x64xf32, #tpu.memory_space<vmem>>, vector<1x32xf32>
    tpu.vector_store %arg7[%92, %c0_38], %91 {strides = array<i32>} : memref<8x64xf32, #tpu.memory_space<vmem>>, vector<1x32xf32>,
    %94 = vector.extract_strided_slice %90 {offsets = [0, 32], sizes = [1, 32], strides = [1, 1]} : vector<1x64xf32> to vector<1x32xf32>
    %c7_i32_39 = arith.constant 7 : i32
    %95 = arith.subi %c7_i32_39, %c1_i32_30 : i32
    %96 = arith.index_cast %95 : i32 to index
    %c32_40 = arith.constant 32 : index
    %97 = vector.load %arg7[%96, %c32_40] : memref<8x64xf32, #tpu.memory_space<vmem>>, vector<1x32xf32>
    tpu.vector_store %arg7[%96, %c32_40], %94 {strides = array<i32>} : memref<8x64xf32, #tpu.memory_space<vmem>>, vector<1x32xf32>,
    %c2_i32 = arith.constant 2 : i32
    %98 = arith.index_cast %c2_i32 : i32 to index
    %c0_41 = arith.constant 0 : index
    %99 = vector.load %arg10[%98, %c0_41] : memref<8x192xf32, #tpu.memory_space<vmem>>, vector<1x192xf32>
    %c7_i32_42 = arith.constant 7 : i32
    %100 = arith.subi %c7_i32_42, %c2_i32 : i32
    %101 = arith.index_cast %100 : i32 to index
    %c0_43 = arith.constant 0 : index
    %102 = vector.load %arg10[%101, %c0_43] : memref<8x192xf32, #tpu.memory_space<vmem>>, vector<1x192xf32>
    %103 = arith.select %28, %99, %102 : vector<1x192xi1>, vector<1x192xf32>
    %c0_44 = arith.constant 0 : index
    %c0_45 = arith.constant 0 : index
    %104 = vector.load %arg5[%c0_44, %c0_45] : memref<64x192xf32, #tpu.memory_space<vmem>>, vector<64x192xf32>
    %cst_46 = arith.constant dense<0.000000e+00> : vector<1x192xf32>
    %105 = tpu.matmul %90, %104, %cst_46 {dimension_numbers = #tpu.dot_dimension_numbers<[1], [0], [0], [1], [0, 0, 1, 1], [], []>} : vector<1x64xf32>, vector<64x192xf32>, vector<1x192xf32> -> vector<1x192xf32>
    %106 = vector.extract_strided_slice %103 {offsets = [0, 0], sizes = [1, 128], strides = [1, 1]} : vector<1x192xf32> to vector<1x128xf32>
    %107 = vector.extract_strided_slice %105 {offsets = [0, 0], sizes = [1, 128], strides = [1, 1]} : vector<1x192xf32> to vector<1x128xf32>
    %108 = arith.addf %106, %107 : vector<1x128xf32>
    %109 = arith.negf %108 : vector<1x128xf32>
    %110 = math.exp %109 : vector<1x128xf32>
    %cst_47 = arith.constant 1.000000e+00 : f32
    %111 = vector.broadcast %cst_47 : f32 to vector<1x128xf32>
    %112 = arith.addf %111, %110 : vector<1x128xf32>
    %113 = arith.divf %111, %112 : vector<1x128xf32>
    %114 = vector.extract_strided_slice %113 {offsets = [0, 0], sizes = [1, 64], strides = [1, 1]} : vector<1x128xf32> to vector<1x64xf32>
    %115 = vector.extract_strided_slice %113 {offsets = [0, 64], sizes = [1, 64], strides = [1, 1]} : vector<1x128xf32> to vector<1x64xf32>
    %116 = vector.extract_strided_slice %103 {offsets = [0, 128], sizes = [1, 64], strides = [1, 1]} : vector<1x192xf32> to vector<1x64xf32>
    %117 = vector.extract_strided_slice %105 {offsets = [0, 128], sizes = [1, 64], strides = [1, 1]} : vector<1x192xf32> to vector<1x64xf32>
    %118 = arith.addf %117, %9 : vector<1x64xf32>
    %119 = arith.mulf %114, %118 : vector<1x64xf32>
    %120 = arith.addf %116, %119 : vector<1x64xf32>
    %121 = math.tanh %120 : vector<1x64xf32>
    %122 = arith.subf %90, %121 : vector<1x64xf32>
    %123 = arith.mulf %115, %122 : vector<1x64xf32>
    %124 = arith.addf %121, %123 : vector<1x64xf32>
    %125 = vector.extract_strided_slice %124 {offsets = [0, 0], sizes = [1, 32], strides = [1, 1]} : vector<1x64xf32> to vector<1x32xf32>
    %126 = arith.index_cast %c2_i32 : i32 to index
    %c0_48 = arith.constant 0 : index
    %127 = vector.load %arg7[%126, %c0_48] : memref<8x64xf32, #tpu.memory_space<vmem>>, vector<1x32xf32>
    tpu.vector_store %arg7[%126, %c0_48], %125 {strides = array<i32>} : memref<8x64xf32, #tpu.memory_space<vmem>>, vector<1x32xf32>,
    %128 = vector.extract_strided_slice %124 {offsets = [0, 32], sizes = [1, 32], strides = [1, 1]} : vector<1x64xf32> to vector<1x32xf32>
    %c7_i32_49 = arith.constant 7 : i32
    %129 = arith.subi %c7_i32_49, %c2_i32 : i32
    %130 = arith.index_cast %129 : i32 to index
    %c32_50 = arith.constant 32 : index
    %131 = vector.load %arg7[%130, %c32_50] : memref<8x64xf32, #tpu.memory_space<vmem>>, vector<1x32xf32>
    tpu.vector_store %arg7[%130, %c32_50], %128 {strides = array<i32>} : memref<8x64xf32, #tpu.memory_space<vmem>>, vector<1x32xf32>,
    %c3_i32 = arith.constant 3 : i32
    %132 = arith.index_cast %c3_i32 : i32 to index
    %c0_51 = arith.constant 0 : index
    %133 = vector.load %arg10[%132, %c0_51] : memref<8x192xf32, #tpu.memory_space<vmem>>, vector<1x192xf32>
    %c7_i32_52 = arith.constant 7 : i32
    %134 = arith.subi %c7_i32_52, %c3_i32 : i32
    %135 = arith.index_cast %134 : i32 to index
    %c0_53 = arith.constant 0 : index
    %136 = vector.load %arg10[%135, %c0_53] : memref<8x192xf32, #tpu.memory_space<vmem>>, vector<1x192xf32>
    %137 = arith.select %28, %133, %136 : vector<1x192xi1>, vector<1x192xf32>
    %c0_54 = arith.constant 0 : index
    %c0_55 = arith.constant 0 : index
    %138 = vector.load %arg5[%c0_54, %c0_55] : memref<64x192xf32, #tpu.memory_space<vmem>>, vector<64x192xf32>
    %cst_56 = arith.constant dense<0.000000e+00> : vector<1x192xf32>
    %139 = tpu.matmul %124, %138, %cst_56 {dimension_numbers = #tpu.dot_dimension_numbers<[1], [0], [0], [1], [0, 0, 1, 1], [], []>} : vector<1x64xf32>, vector<64x192xf32>, vector<1x192xf32> -> vector<1x192xf32>
    %140 = vector.extract_strided_slice %137 {offsets = [0, 0], sizes = [1, 128], strides = [1, 1]} : vector<1x192xf32> to vector<1x128xf32>
    %141 = vector.extract_strided_slice %139 {offsets = [0, 0], sizes = [1, 128], strides = [1, 1]} : vector<1x192xf32> to vector<1x128xf32>
    %142 = arith.addf %140, %141 : vector<1x128xf32>
    %143 = arith.negf %142 : vector<1x128xf32>
    %144 = math.exp %143 : vector<1x128xf32>
    %cst_57 = arith.constant 1.000000e+00 : f32
    %145 = vector.broadcast %cst_57 : f32 to vector<1x128xf32>
    %146 = arith.addf %145, %144 : vector<1x128xf32>
    %147 = arith.divf %145, %146 : vector<1x128xf32>
    %148 = vector.extract_strided_slice %147 {offsets = [0, 0], sizes = [1, 64], strides = [1, 1]} : vector<1x128xf32> to vector<1x64xf32>
    %149 = vector.extract_strided_slice %147 {offsets = [0, 64], sizes = [1, 64], strides = [1, 1]} : vector<1x128xf32> to vector<1x64xf32>
    %150 = vector.extract_strided_slice %137 {offsets = [0, 128], sizes = [1, 64], strides = [1, 1]} : vector<1x192xf32> to vector<1x64xf32>
    %151 = vector.extract_strided_slice %139 {offsets = [0, 128], sizes = [1, 64], strides = [1, 1]} : vector<1x192xf32> to vector<1x64xf32>
    %152 = arith.addf %151, %9 : vector<1x64xf32>
    %153 = arith.mulf %148, %152 : vector<1x64xf32>
    %154 = arith.addf %150, %153 : vector<1x64xf32>
    %155 = math.tanh %154 : vector<1x64xf32>
    %156 = arith.subf %124, %155 : vector<1x64xf32>
    %157 = arith.mulf %149, %156 : vector<1x64xf32>
    %158 = arith.addf %155, %157 : vector<1x64xf32>
    %159 = vector.extract_strided_slice %158 {offsets = [0, 0], sizes = [1, 32], strides = [1, 1]} : vector<1x64xf32> to vector<1x32xf32>
    %160 = arith.index_cast %c3_i32 : i32 to index
    %c0_58 = arith.constant 0 : index
    %161 = vector.load %arg7[%160, %c0_58] : memref<8x64xf32, #tpu.memory_space<vmem>>, vector<1x32xf32>
    tpu.vector_store %arg7[%160, %c0_58], %159 {strides = array<i32>} : memref<8x64xf32, #tpu.memory_space<vmem>>, vector<1x32xf32>,
    %162 = vector.extract_strided_slice %158 {offsets = [0, 32], sizes = [1, 32], strides = [1, 1]} : vector<1x64xf32> to vector<1x32xf32>
    %c7_i32_59 = arith.constant 7 : i32
    %163 = arith.subi %c7_i32_59, %c3_i32 : i32
    %164 = arith.index_cast %163 : i32 to index
    %c32_60 = arith.constant 32 : index
    %165 = vector.load %arg7[%164, %c32_60] : memref<8x64xf32, #tpu.memory_space<vmem>>, vector<1x32xf32>
    tpu.vector_store %arg7[%164, %c32_60], %162 {strides = array<i32>} : memref<8x64xf32, #tpu.memory_space<vmem>>, vector<1x32xf32>,
    %c4_i32 = arith.constant 4 : i32
    %166 = arith.index_cast %c4_i32 : i32 to index
    %c0_61 = arith.constant 0 : index
    %167 = vector.load %arg10[%166, %c0_61] : memref<8x192xf32, #tpu.memory_space<vmem>>, vector<1x192xf32>
    %c7_i32_62 = arith.constant 7 : i32
    %168 = arith.subi %c7_i32_62, %c4_i32 : i32
    %169 = arith.index_cast %168 : i32 to index
    %c0_63 = arith.constant 0 : index
    %170 = vector.load %arg10[%169, %c0_63] : memref<8x192xf32, #tpu.memory_space<vmem>>, vector<1x192xf32>
    %171 = arith.select %28, %167, %170 : vector<1x192xi1>, vector<1x192xf32>
    %c0_64 = arith.constant 0 : index
    %c0_65 = arith.constant 0 : index
    %172 = vector.load %arg5[%c0_64, %c0_65] : memref<64x192xf32, #tpu.memory_space<vmem>>, vector<64x192xf32>
    %cst_66 = arith.constant dense<0.000000e+00> : vector<1x192xf32>
    %173 = tpu.matmul %158, %172, %cst_66 {dimension_numbers = #tpu.dot_dimension_numbers<[1], [0], [0], [1], [0, 0, 1, 1], [], []>} : vector<1x64xf32>, vector<64x192xf32>, vector<1x192xf32> -> vector<1x192xf32>
    %174 = vector.extract_strided_slice %171 {offsets = [0, 0], sizes = [1, 128], strides = [1, 1]} : vector<1x192xf32> to vector<1x128xf32>
    %175 = vector.extract_strided_slice %173 {offsets = [0, 0], sizes = [1, 128], strides = [1, 1]} : vector<1x192xf32> to vector<1x128xf32>
    %176 = arith.addf %174, %175 : vector<1x128xf32>
    %177 = arith.negf %176 : vector<1x128xf32>
    %178 = math.exp %177 : vector<1x128xf32>
    %cst_67 = arith.constant 1.000000e+00 : f32
    %179 = vector.broadcast %cst_67 : f32 to vector<1x128xf32>
    %180 = arith.addf %179, %178 : vector<1x128xf32>
    %181 = arith.divf %179, %180 : vector<1x128xf32>
    %182 = vector.extract_strided_slice %181 {offsets = [0, 0], sizes = [1, 64], strides = [1, 1]} : vector<1x128xf32> to vector<1x64xf32>
    %183 = vector.extract_strided_slice %181 {offsets = [0, 64], sizes = [1, 64], strides = [1, 1]} : vector<1x128xf32> to vector<1x64xf32>
    %184 = vector.extract_strided_slice %171 {offsets = [0, 128], sizes = [1, 64], strides = [1, 1]} : vector<1x192xf32> to vector<1x64xf32>
    %185 = vector.extract_strided_slice %173 {offsets = [0, 128], sizes = [1, 64], strides = [1, 1]} : vector<1x192xf32> to vector<1x64xf32>
    %186 = arith.addf %185, %9 : vector<1x64xf32>
    %187 = arith.mulf %182, %186 : vector<1x64xf32>
    %188 = arith.addf %184, %187 : vector<1x64xf32>
    %189 = math.tanh %188 : vector<1x64xf32>
    %190 = arith.subf %158, %189 : vector<1x64xf32>
    %191 = arith.mulf %183, %190 : vector<1x64xf32>
    %192 = arith.addf %189, %191 : vector<1x64xf32>
    %193 = vector.extract_strided_slice %192 {offsets = [0, 0], sizes = [1, 32], strides = [1, 1]} : vector<1x64xf32> to vector<1x32xf32>
    %194 = arith.index_cast %c4_i32 : i32 to index
    %c0_68 = arith.constant 0 : index
    %195 = vector.load %arg7[%194, %c0_68] : memref<8x64xf32, #tpu.memory_space<vmem>>, vector<1x32xf32>
    tpu.vector_store %arg7[%194, %c0_68], %193 {strides = array<i32>} : memref<8x64xf32, #tpu.memory_space<vmem>>, vector<1x32xf32>,
    %196 = vector.extract_strided_slice %192 {offsets = [0, 32], sizes = [1, 32], strides = [1, 1]} : vector<1x64xf32> to vector<1x32xf32>
    %c7_i32_69 = arith.constant 7 : i32
    %197 = arith.subi %c7_i32_69, %c4_i32 : i32
    %198 = arith.index_cast %197 : i32 to index
    %c32_70 = arith.constant 32 : index
    %199 = vector.load %arg7[%198, %c32_70] : memref<8x64xf32, #tpu.memory_space<vmem>>, vector<1x32xf32>
    tpu.vector_store %arg7[%198, %c32_70], %196 {strides = array<i32>} : memref<8x64xf32, #tpu.memory_space<vmem>>, vector<1x32xf32>,
    %c5_i32 = arith.constant 5 : i32
    %200 = arith.index_cast %c5_i32 : i32 to index
    %c0_71 = arith.constant 0 : index
    %201 = vector.load %arg10[%200, %c0_71] : memref<8x192xf32, #tpu.memory_space<vmem>>, vector<1x192xf32>
    %c7_i32_72 = arith.constant 7 : i32
    %202 = arith.subi %c7_i32_72, %c5_i32 : i32
    %203 = arith.index_cast %202 : i32 to index
    %c0_73 = arith.constant 0 : index
    %204 = vector.load %arg10[%203, %c0_73] : memref<8x192xf32, #tpu.memory_space<vmem>>, vector<1x192xf32>
    %205 = arith.select %28, %201, %204 : vector<1x192xi1>, vector<1x192xf32>
    %c0_74 = arith.constant 0 : index
    %c0_75 = arith.constant 0 : index
    %206 = vector.load %arg5[%c0_74, %c0_75] : memref<64x192xf32, #tpu.memory_space<vmem>>, vector<64x192xf32>
    %cst_76 = arith.constant dense<0.000000e+00> : vector<1x192xf32>
    %207 = tpu.matmul %192, %206, %cst_76 {dimension_numbers = #tpu.dot_dimension_numbers<[1], [0], [0], [1], [0, 0, 1, 1], [], []>} : vector<1x64xf32>, vector<64x192xf32>, vector<1x192xf32> -> vector<1x192xf32>
    %208 = vector.extract_strided_slice %205 {offsets = [0, 0], sizes = [1, 128], strides = [1, 1]} : vector<1x192xf32> to vector<1x128xf32>
    %209 = vector.extract_strided_slice %207 {offsets = [0, 0], sizes = [1, 128], strides = [1, 1]} : vector<1x192xf32> to vector<1x128xf32>
    %210 = arith.addf %208, %209 : vector<1x128xf32>
    %211 = arith.negf %210 : vector<1x128xf32>
    %212 = math.exp %211 : vector<1x128xf32>
    %cst_77 = arith.constant 1.000000e+00 : f32
    %213 = vector.broadcast %cst_77 : f32 to vector<1x128xf32>
    %214 = arith.addf %213, %212 : vector<1x128xf32>
    %215 = arith.divf %213, %214 : vector<1x128xf32>
    %216 = vector.extract_strided_slice %215 {offsets = [0, 0], sizes = [1, 64], strides = [1, 1]} : vector<1x128xf32> to vector<1x64xf32>
    %217 = vector.extract_strided_slice %215 {offsets = [0, 64], sizes = [1, 64], strides = [1, 1]} : vector<1x128xf32> to vector<1x64xf32>
    %218 = vector.extract_strided_slice %205 {offsets = [0, 128], sizes = [1, 64], strides = [1, 1]} : vector<1x192xf32> to vector<1x64xf32>
    %219 = vector.extract_strided_slice %207 {offsets = [0, 128], sizes = [1, 64], strides = [1, 1]} : vector<1x192xf32> to vector<1x64xf32>
    %220 = arith.addf %219, %9 : vector<1x64xf32>
    %221 = arith.mulf %216, %220 : vector<1x64xf32>
    %222 = arith.addf %218, %221 : vector<1x64xf32>
    %223 = math.tanh %222 : vector<1x64xf32>
    %224 = arith.subf %192, %223 : vector<1x64xf32>
    %225 = arith.mulf %217, %224 : vector<1x64xf32>
    %226 = arith.addf %223, %225 : vector<1x64xf32>
    %227 = vector.extract_strided_slice %226 {offsets = [0, 0], sizes = [1, 32], strides = [1, 1]} : vector<1x64xf32> to vector<1x32xf32>
    %228 = arith.index_cast %c5_i32 : i32 to index
    %c0_78 = arith.constant 0 : index
    %229 = vector.load %arg7[%228, %c0_78] : memref<8x64xf32, #tpu.memory_space<vmem>>, vector<1x32xf32>
    tpu.vector_store %arg7[%228, %c0_78], %227 {strides = array<i32>} : memref<8x64xf32, #tpu.memory_space<vmem>>, vector<1x32xf32>,
    %230 = vector.extract_strided_slice %226 {offsets = [0, 32], sizes = [1, 32], strides = [1, 1]} : vector<1x64xf32> to vector<1x32xf32>
    %c7_i32_79 = arith.constant 7 : i32
    %231 = arith.subi %c7_i32_79, %c5_i32 : i32
    %232 = arith.index_cast %231 : i32 to index
    %c32_80 = arith.constant 32 : index
    %233 = vector.load %arg7[%232, %c32_80] : memref<8x64xf32, #tpu.memory_space<vmem>>, vector<1x32xf32>
    tpu.vector_store %arg7[%232, %c32_80], %230 {strides = array<i32>} : memref<8x64xf32, #tpu.memory_space<vmem>>, vector<1x32xf32>,
    %c6_i32 = arith.constant 6 : i32
    %234 = arith.index_cast %c6_i32 : i32 to index
    %c0_81 = arith.constant 0 : index
    %235 = vector.load %arg10[%234, %c0_81] : memref<8x192xf32, #tpu.memory_space<vmem>>, vector<1x192xf32>
    %c7_i32_82 = arith.constant 7 : i32
    %236 = arith.subi %c7_i32_82, %c6_i32 : i32
    %237 = arith.index_cast %236 : i32 to index
    %c0_83 = arith.constant 0 : index
    %238 = vector.load %arg10[%237, %c0_83] : memref<8x192xf32, #tpu.memory_space<vmem>>, vector<1x192xf32>
    %239 = arith.select %28, %235, %238 : vector<1x192xi1>, vector<1x192xf32>
    %c0_84 = arith.constant 0 : index
    %c0_85 = arith.constant 0 : index
    %240 = vector.load %arg5[%c0_84, %c0_85] : memref<64x192xf32, #tpu.memory_space<vmem>>, vector<64x192xf32>
    %cst_86 = arith.constant dense<0.000000e+00> : vector<1x192xf32>
    %241 = tpu.matmul %226, %240, %cst_86 {dimension_numbers = #tpu.dot_dimension_numbers<[1], [0], [0], [1], [0, 0, 1, 1], [], []>} : vector<1x64xf32>, vector<64x192xf32>, vector<1x192xf32> -> vector<1x192xf32>
    %242 = vector.extract_strided_slice %239 {offsets = [0, 0], sizes = [1, 128], strides = [1, 1]} : vector<1x192xf32> to vector<1x128xf32>
    %243 = vector.extract_strided_slice %241 {offsets = [0, 0], sizes = [1, 128], strides = [1, 1]} : vector<1x192xf32> to vector<1x128xf32>
    %244 = arith.addf %242, %243 : vector<1x128xf32>
    %245 = arith.negf %244 : vector<1x128xf32>
    %246 = math.exp %245 : vector<1x128xf32>
    %cst_87 = arith.constant 1.000000e+00 : f32
    %247 = vector.broadcast %cst_87 : f32 to vector<1x128xf32>
    %248 = arith.addf %247, %246 : vector<1x128xf32>
    %249 = arith.divf %247, %248 : vector<1x128xf32>
    %250 = vector.extract_strided_slice %249 {offsets = [0, 0], sizes = [1, 64], strides = [1, 1]} : vector<1x128xf32> to vector<1x64xf32>
    %251 = vector.extract_strided_slice %249 {offsets = [0, 64], sizes = [1, 64], strides = [1, 1]} : vector<1x128xf32> to vector<1x64xf32>
    %252 = vector.extract_strided_slice %239 {offsets = [0, 128], sizes = [1, 64], strides = [1, 1]} : vector<1x192xf32> to vector<1x64xf32>
    %253 = vector.extract_strided_slice %241 {offsets = [0, 128], sizes = [1, 64], strides = [1, 1]} : vector<1x192xf32> to vector<1x64xf32>
    %254 = arith.addf %253, %9 : vector<1x64xf32>
    %255 = arith.mulf %250, %254 : vector<1x64xf32>
    %256 = arith.addf %252, %255 : vector<1x64xf32>
    %257 = math.tanh %256 : vector<1x64xf32>
    %258 = arith.subf %226, %257 : vector<1x64xf32>
    %259 = arith.mulf %251, %258 : vector<1x64xf32>
    %260 = arith.addf %257, %259 : vector<1x64xf32>
    %261 = vector.extract_strided_slice %260 {offsets = [0, 0], sizes = [1, 32], strides = [1, 1]} : vector<1x64xf32> to vector<1x32xf32>
    %262 = arith.index_cast %c6_i32 : i32 to index
    %c0_88 = arith.constant 0 : index
    %263 = vector.load %arg7[%262, %c0_88] : memref<8x64xf32, #tpu.memory_space<vmem>>, vector<1x32xf32>
    tpu.vector_store %arg7[%262, %c0_88], %261 {strides = array<i32>} : memref<8x64xf32, #tpu.memory_space<vmem>>, vector<1x32xf32>,
    %264 = vector.extract_strided_slice %260 {offsets = [0, 32], sizes = [1, 32], strides = [1, 1]} : vector<1x64xf32> to vector<1x32xf32>
    %c7_i32_89 = arith.constant 7 : i32
    %265 = arith.subi %c7_i32_89, %c6_i32 : i32
    %266 = arith.index_cast %265 : i32 to index
    %c32_90 = arith.constant 32 : index
    %267 = vector.load %arg7[%266, %c32_90] : memref<8x64xf32, #tpu.memory_space<vmem>>, vector<1x32xf32>
    tpu.vector_store %arg7[%266, %c32_90], %264 {strides = array<i32>} : memref<8x64xf32, #tpu.memory_space<vmem>>, vector<1x32xf32>,
    %c7_i32_91 = arith.constant 7 : i32
    %268 = arith.index_cast %c7_i32_91 : i32 to index
    %c0_92 = arith.constant 0 : index
    %269 = vector.load %arg10[%268, %c0_92] : memref<8x192xf32, #tpu.memory_space<vmem>>, vector<1x192xf32>
    %c7_i32_93 = arith.constant 7 : i32
    %270 = arith.subi %c7_i32_93, %c7_i32_91 : i32
    %271 = arith.index_cast %270 : i32 to index
    %c0_94 = arith.constant 0 : index
    %272 = vector.load %arg10[%271, %c0_94] : memref<8x192xf32, #tpu.memory_space<vmem>>, vector<1x192xf32>
    %273 = arith.select %28, %269, %272 : vector<1x192xi1>, vector<1x192xf32>
    %c0_95 = arith.constant 0 : index
    %c0_96 = arith.constant 0 : index
    %274 = vector.load %arg5[%c0_95, %c0_96] : memref<64x192xf32, #tpu.memory_space<vmem>>, vector<64x192xf32>
    %cst_97 = arith.constant dense<0.000000e+00> : vector<1x192xf32>
    %275 = tpu.matmul %260, %274, %cst_97 {dimension_numbers = #tpu.dot_dimension_numbers<[1], [0], [0], [1], [0, 0, 1, 1], [], []>} : vector<1x64xf32>, vector<64x192xf32>, vector<1x192xf32> -> vector<1x192xf32>
    %276 = vector.extract_strided_slice %273 {offsets = [0, 0], sizes = [1, 128], strides = [1, 1]} : vector<1x192xf32> to vector<1x128xf32>
    %277 = vector.extract_strided_slice %275 {offsets = [0, 0], sizes = [1, 128], strides = [1, 1]} : vector<1x192xf32> to vector<1x128xf32>
    %278 = arith.addf %276, %277 : vector<1x128xf32>
    %279 = arith.negf %278 : vector<1x128xf32>
    %280 = math.exp %279 : vector<1x128xf32>
    %cst_98 = arith.constant 1.000000e+00 : f32
    %281 = vector.broadcast %cst_98 : f32 to vector<1x128xf32>
    %282 = arith.addf %281, %280 : vector<1x128xf32>
    %283 = arith.divf %281, %282 : vector<1x128xf32>
    %284 = vector.extract_strided_slice %283 {offsets = [0, 0], sizes = [1, 64], strides = [1, 1]} : vector<1x128xf32> to vector<1x64xf32>
    %285 = vector.extract_strided_slice %283 {offsets = [0, 64], sizes = [1, 64], strides = [1, 1]} : vector<1x128xf32> to vector<1x64xf32>
    %286 = vector.extract_strided_slice %273 {offsets = [0, 128], sizes = [1, 64], strides = [1, 1]} : vector<1x192xf32> to vector<1x64xf32>
    %287 = vector.extract_strided_slice %275 {offsets = [0, 128], sizes = [1, 64], strides = [1, 1]} : vector<1x192xf32> to vector<1x64xf32>
    %288 = arith.addf %287, %9 : vector<1x64xf32>
    %289 = arith.mulf %284, %288 : vector<1x64xf32>
    %290 = arith.addf %286, %289 : vector<1x64xf32>
    %291 = math.tanh %290 : vector<1x64xf32>
    %292 = arith.subf %260, %291 : vector<1x64xf32>
    %293 = arith.mulf %285, %292 : vector<1x64xf32>
    %294 = arith.addf %291, %293 : vector<1x64xf32>
    %295 = vector.extract_strided_slice %294 {offsets = [0, 0], sizes = [1, 32], strides = [1, 1]} : vector<1x64xf32> to vector<1x32xf32>
    %296 = arith.index_cast %c7_i32_91 : i32 to index
    %c0_99 = arith.constant 0 : index
    %297 = vector.load %arg7[%296, %c0_99] : memref<8x64xf32, #tpu.memory_space<vmem>>, vector<1x32xf32>
    tpu.vector_store %arg7[%296, %c0_99], %295 {strides = array<i32>} : memref<8x64xf32, #tpu.memory_space<vmem>>, vector<1x32xf32>,
    %298 = vector.extract_strided_slice %294 {offsets = [0, 32], sizes = [1, 32], strides = [1, 1]} : vector<1x64xf32> to vector<1x32xf32>
    %c7_i32_100 = arith.constant 7 : i32
    %299 = arith.subi %c7_i32_100, %c7_i32_91 : i32
    %300 = arith.index_cast %299 : i32 to index
    %c32_101 = arith.constant 32 : index
    %301 = vector.load %arg7[%300, %c32_101] : memref<8x64xf32, #tpu.memory_space<vmem>>, vector<1x32xf32>
    tpu.vector_store %arg7[%300, %c32_101], %298 {strides = array<i32>} : memref<8x64xf32, #tpu.memory_space<vmem>>, vector<1x32xf32>,
    %c8_i32_102 = arith.constant 8 : i32
    %c0_103 = arith.constant 0 : index
    %c0_104 = arith.constant 0 : index
    %302 = vector.load %arg8[%c0_103, %c0_104] : memref<1x64xf32, #tpu.memory_space<vmem>>, vector<1x64xf32>
    tpu.vector_store %arg8[%c0_103, %c0_104], %294 {strides = array<i32>} : memref<1x64xf32, #tpu.memory_space<vmem>>, vector<1x64xf32>,
    return
  }
}

</mosaic_0001>

<bundles_post_ra>
// kernel: tpu_custom_call.1
= control target key start
LH: loop header
LB: loop body
LE: loop exit
PB: predicated region body
PF: predicated region fallthrough
CT: control target
= control target key end

     0   :  { %14 = vsyncpa [#allocation8], 0  ;;  %s2095_s0 = inlined_call_operand.vmem [shape: s32[8], index: 0, kind: input, shape index: {}]   ;;  %s2096_s1 = inlined_call_operand.vmem [shape: f32[50,32], index: 1, kind: input, shape index: {}]   ;;  %s2097_s2 = inlined_call_operand.vmem [shape: f32[1,64], index: 2, kind: input, shape index: {}]   ;;  %s2098_s3 = inlined_call_operand.vmem [shape: f32[32,192], index: 3, kind: input, shape index: {}]   ;;  %s2099_s4 = inlined_call_operand.vmem [shape: f32[1,192], index: 4, kind: input, shape index: {}]   ;;  %s2100_s5 = inlined_call_operand.hbm [shape: f32[64,192], index: 5, kind: input, shape index: {}]   ;;  %s2101_s6 = inlined_call_operand.vmem [shape: f32[1,64], index: 6, kind: input, shape index: {}]   ;;  %s2102_s7 = inlined_call_operand.hbm [shape: f32[8,64], index: 7, kind: output, shape index: {0}]   ;;  %s2103_s8 = inlined_call_operand.hbm [shape: f32[1,64], index: 8, kind: output, shape index: {1}]  }
   0x1   :  { %15 = vsyncpa [#allocation6], 0 }
   0x2   :  { %16 = vsyncpa [#allocation7], 0 }
   0x3   :  { %17 = vsyncpa [#allocation12], 0  ;;  %s24_s29 = sshll.u32 %s2095_s0, 4  ;;  %s25_s29 = int_to_ptr.vmem [resolvable:$true] %s24_s29 }
   0x4   :  { %s1593_s30 = scalar_lea.vmem %s25_s29, 16  ;;  %p1598_p1 = scmp.lt.s32.totalorder %s25_s29, %s25_s29 }
   0x5   :  { %p1594_p0 = scmp.ne.s32.totalorder %s25_s29, %s1593_s30  ;;  %p1599_p2 = scmp.lt.s32.totalorder %s1593_s30, %s1593_s30 }
   0x7   :  { %p1600_p3 = por %p1599_p2, %p1598_p1 }
   0x9   :  { %p1601_p4 = pnand %p1600_p3, %p1594_p0 }
   0xb   :  { %1604 = shalt.err (!%p1601_p4)
}
   0xc   :  { %s1691_s9 = smov [#allocation5]   ;;  %s1692_s10 = smov [#allocation9]  }
   0xd   :  { %27 = dma.vmem_to_smem %s25_s29, 16, %s1691_s9, [#allocation8]  }
   0xe   :  { %s39_s11 = sshll.u32 %s1692_s10, 4  ;;  %s40_s11 = int_to_ptr.vmem [resolvable:$true] %s39_s11 }
   0xf   :  { %s1613_s12 = scalar_lea.vmem %s40_s11, 2048  ;;  %p1618_p6 = scmp.lt.s32.totalorder %s40_s11, %s40_s11 }
  0x10   :  { %p1614_p5 = scmp.ne.s32.totalorder %s40_s11, %s1613_s12  ;;  %p1619_p7 = scmp.lt.s32.totalorder %s1613_s12, %s1613_s12 }
  0x12   :  { %p1620_p8 = por %p1619_p7, %p1618_p6 }
  0x14   :  { %p1621_p9 = pnand %p1620_p8, %p1614_p5 }
  0x16   :  { %1624 = shalt.err (!%p1621_p9)
}
  0x17   :  { %s1693_s0 = smov 256   ;;  %s1694_s13 = smov 16  }
  0x18   :  { %45 = dma.hbm_to_vmem [thread:$0]  %s2100_s5, 2048, %s40_s11, [#allocation6], %s1693_s0, %s1693_s0, %s1694_s13  }
  0x19   :  { %1673 = dma.done.wait [#allocation8], 16  }
  0x1a   :  { %1674 = vsyncadd [#allocation8], 4294967280 }
  0x1b   :  { %1675 = dma.done.wait [#allocation6], 2048  }
  0x1c   :  { %1676 = vsyncadd [#allocation6], 4294965248 }
  0x1d   :  { %54 = sfence }
  0x1e   :  { %s1683_s16 = smov 0  }
  0x1f LB: > { %s61_s17 = sld [smem:[#allocation5 + %s1685_s16]]  ;;  %s63_s21 = scalar_lea.vmem [#allocation2], %s1685_s16  ;;  %s1685_s16 = sphi %s1683_s16, %s60_s16  }
  0x20   : > { %s64_s22 = scalar_lea.sflag [#allocation4], %s1685_s16 }
  0x25   : > { %s62_s20 = scalar_lea.vmem %s2096_s1, %s61_s17 }
  0x26   : > { %v83_v0 = vld [vmem:[%s62_s20] sm:$0x1] }
  0x27   : > { %84 = vst [vmem:[%s63_s21] sm:$0x1] %v83_v0 }
  0x28   : > { %110 = vsyncadd %s64_s22, 16  ;;  %s60_s16 = sadd.s32 1, %s1685_s16  }
  0x29   : > { %p57_p10 = scmp.ge.s32.totalorder %s60_s16, 8  }
  0x2a   :  { %s1687_s5 = smov (%p57_p10), 0  }
  0x2b   :  { %59 = sbr.rel (!%p57_p10) target bundleno = 31 (0x1f), region = 132 }
  0x30 LB: > { %s118_s23 = scalar_lea.sflag [#allocation4], %s1689_s5  ;;  %s1689_s5 = sphi %s1687_s5, %s116_s5  }
  0x31   : > { %1677 = dma.done.wait %s118_s23, 16 }
  0x32   : > { %1678 = vsyncadd %s118_s23, 4294967280  ;;  %s116_s5 = sadd.s32 1, %s1689_s5  }
  0x33   : > { %p113_p11 = scmp.ge.s32.totalorder %s116_s5, 8  }
  0x34   :  { %v130_v1 = vld [vmem:[%s2098_s3 + $0x38] sm:$0xff] (%p113_p11)  ;;  %v129_v2 = vld [vmem:[%s2098_s3 + $0x30] sm:$0xff] (%p113_p11)  ;;  %v128_v3 = vld [vmem:[%s2098_s3 + $0x28] sm:$0xff] (%p113_p11)  ;;  %v1695_v5 = vmov (%p113_p11), 0.0   ;;  %vm143_vm0 = vcmask (%p113_p11), 261120   ;;  %vm219_vm1 = vcmask (%p113_p11), 523264   ;;  %v133_v28 = vlaneseq (%p113_p11) }
  0x35   :  { %115 = sbr.rel (!%p113_p11) target bundleno = 48 (0x30), region = 143  ;;  %171 = vmatprep.subr.mxu0 (%p113_p11), %v130_v1  ;;  %v127_v4 = vld [vmem:[%s2098_s3 + $0x20] sm:$0xff] (%p113_p11)  ;;  %211 = vmatprep.mubr.f32.mxu0 (%p113_p11), %v1695_v5  ;;  %v126_v6 = vld [vmem:[%s2098_s3 + $0x18] sm:$0xff] (%p113_p11)  ;;  %v1769_v7 = vld [vmem:[#allocation9 + $0x78] sm:$0xff] (%p113_p11)  ;;  %vm395_vm4 = vcmask (%p113_p11), 253952   ;;  %vm397_vm5 = vcmask (%p113_p11), 516352  }
  0x36   :  { %172 = vmatpush1.msra.mxu0 (%p113_p11), %v129_v2  ;;  %v1771_v8 = vld [vmem:[#allocation9 + $0x70] sm:$0xff] (%p113_p11)  ;;  %362 = vmatprep.mubr.f32.mxu1 (%p113_p11), %v1695_v5  ;;  %v125_v9 = vld [vmem:[%s2098_s3 + $0x10] sm:$0xff] (%p113_p11)  ;;  %v1778_v10 = vld [vmem:[#allocation9 + $0x68] sm:$0xff] (%p113_p11)  ;;  %v134_v29 = vshrl.u32 (%p113_p11), %v133_v28, 7  ;;  %v223_v39 = vand.u32 (%p113_p11), 127, %v133_v28  ;;  %s1697_s19 = smov (%p113_p11), [#allocation10]  }
  0x37   :  { %173 = vmatprep.subr.mxu0 (%p113_p11), %v128_v3  ;;  %314 = vmatprep.subr.mxu1 (%p113_p11), %v1769_v7  ;;  %v124_v11 = vld [vmem:[%s2098_s3 + $0x8] sm:$0xff] (%p113_p11)  ;;  %v1784_v12 = vld [vmem:[#allocation9 + $0x60] sm:$0xff] (%p113_p11)  ;;  %v1786_v13 = vld [vmem:[#allocation9 + $0x58] sm:$0xff] (%p113_p11)  ;;  %s1393_s20 = sshll.u32 (%p113_p11), %s1697_s19, 4  ;;  %s1698_s21 = smov (%p113_p11), [#allocation11]   ;;  %vm1385_vm6 = vcmask (%p113_p11), 516096   ;;  %s1394_s20 = int_to_ptr.vmem [resolvable:$true] %s1393_s20 }
  0x38   :  { %174 = vmatpush1.msra.mxu0 (%p113_p11), %v127_v4  ;;  %315 = vmatpush1.msra.mxu1 (%p113_p11), %v1771_v8  ;;  %v123_v14 = vld [vmem:[%s2098_s3] sm:$0xff] (%p113_p11)  ;;  %v1792_v15 = vld [vmem:[#allocation9 + $0x50] sm:$0xff] (%p113_p11)  ;;  %v1798_v18 = vld [vmem:[#allocation9 + $0x40] sm:$0xff] (%p113_p11)  ;;  %v1870_v30 = vsub.s32 (%p113_p11), 0, %v134_v29  ;;  %v1875_v32 = vsub.s32 (%p113_p11), 1, %v134_v29  ;;  %v229_v40 = vand.u32 (%p113_p11), 63, %v223_v39  ;;  %p1630_p13 = scmp.lt.s32.totalorder (%p113_p11), %s1394_s20, %s1394_s20 }
  0x39   :  { %175 = vmatprep.subr.mxu0 (%p113_p11), %v126_v6  ;;  %316 = vmatprep.subr.mxu1 (%p113_p11), %v1778_v10  ;;  %v122_v16 = vld [vmem:[#allocation2] sm:$0xff] (%p113_p11)  ;;  %v1801_v19 = vld [vmem:[#allocation9 + $0x38] sm:$0xff] (%p113_p11)  ;;  %v1804_v20 = vld [vmem:[#allocation9 + $0x30] sm:$0xff] (%p113_p11)  ;;  %v224_v52 = vadd.s32 (%p113_p11), 128, %v223_v39  ;;  %s1403_s22 = sshll.u32 (%p113_p11), %s1698_s21, 4  ;;  %s1625_s5 = scalar_lea.vmem (%p113_p11), %s1394_s20, 128  ;;  %s1404_s22 = int_to_ptr.vmem [resolvable:$true] %s1403_s22 }
  0x3a   :  { %176 = vmatpush1.msra.mxu0 %v125_v9  ;;  %317 = vmatpush1.msra.mxu1 %v1784_v12  ;;  %v1795_v17 = vld [vmem:[#allocation9 + $0x48] sm:$0xff]  ;;  %v1811_v22 = vld [vmem:[#allocation9 + $0x20] sm:$0xff]  ;;  %v1815_v23 = vld [vmem:[#allocation9 + $0x18] sm:$0xff]  ;;  %vm1880_vm2 = vcmp.lt.s32.totalorder %v229_v40, 32  ;;  %p1626_p12 = scmp.ne.s32.totalorder %s1394_s20, %s1625_s5  ;;  %p1631_p0 = scmp.lt.s32.totalorder %s1625_s5, %s1625_s5 }
  0x3b   :  { %177 = vmatprep.subr.mxu0 %v124_v11  ;;  %318 = vmatprep.subr.mxu1 %v1786_v13  ;;  %v1807_v21 = vld [vmem:[#allocation9 + $0x28] sm:$0xff]  ;;  %v1819_v24 = vld [vmem:[#allocation9 + $0x10] sm:$0xff]  ;;  %v1827_v26 = vld [vmem:[#allocation9] sm:$0xff]  ;;  %v236_v53 = vand.u32 63, %v224_v52 }
  0x3c   :  { %178 = vmatpush1.msra.mxu0 %v123_v14  ;;  %319 = vmatpush1.msra.mxu1 %v1792_v15  ;;  %v1823_v25 = vld [vmem:[#allocation9 + $0x8] sm:$0xff]  ;;  %p1632_p1 = por %p1631_p0, %p1630_p13 }
  0x3d   :  { %1496 = vmatmul.mubr.msk.f32.vlgmr.msra.gmra.mxu0 %vm143_vm0, %v122_v16  ;;  %320 = vmatprep.subr.mxu1 %v1795_v17  ;;  %v1834_v27 = vld [vmem:[%s2097_s2] sm:$0x1]  ;;  %vm1895_vm3 = vcmp.lt.s32.totalorder %v236_v53, 32 }
  0x3e   :  { %321 = vmatpush1.msra.mxu1 %v1798_v18  ;;  %462 = vmatprep.subr.mxu0 %v1769_v7  ;;  %v131_v31 = vld [vmem:[%s2099_s4] sm:$0x3]  ;;  %p1633_p2 = pnand %p1632_p1, %p1626_p12 }
  0x3f   :  { %322 = vmatprep.subr.mxu1 %v1801_v19  ;;  %463 = vmatpush1.msra.mxu0 %v1771_v8  ;;  %v136_v33 = vrot.slane %v131_v31, %v1870_v30  ;;  %v140_v34 = vrot.slane %v131_v31, %v1875_v32  ;;  %v1891_v54 = vld [vmem:[%s2101_s6] sm:$0x1]  ;;  %s1696_s6 = smov 64  }
  0x40   :  { %323 = vmatpush1.msra.mxu1 %v1804_v20  ;;  %464 = vmatprep.subr.mxu0 %v1778_v10 }
  0x41   :  { %324 = vmatprep.subr.mxu1 %v1807_v21  ;;  %465 = vmatpush1.msra.mxu0 %v1784_v12 }
  0x42   :  { %325 = vmatpush1.msra.mxu1 %v1811_v22  ;;  %466 = vmatprep.subr.mxu0 %v1786_v13 }
  0x43   :  { %326 = vmatprep.subr.mxu1 %v1815_v23  ;;  %467 = vmatpush1.msra.mxu0 %v1792_v15 }
  0x44   :  { %327 = vmatpush1.msra.mxu1 %v1819_v24  ;;  %468 = vmatprep.subr.mxu0 %v1795_v17 }
  0x45   :  { %328 = vmatprep.subr.mxu1 %v1823_v25  ;;  %469 = vmatpush1.msra.mxu0 %v1798_v18 }
  0x46   :  { %329 = vmatpush1.msra.mxu1 %v1827_v26  ;;  %470 = vmatprep.subr.mxu0 %v1801_v19 }
  0x47   :  { %1497 = vmatmul.mubr.msk.f32.vlgmr.msra.gmra.mxu1 %vm219_vm1, %v1834_v27  ;;  %471 = vmatpush1.msra.mxu0 %v1804_v20 }
  0x48   :  { %472 = vmatprep.subr.mxu0 %v1807_v21  ;;  %510 = vmatprep.mubr.f32.mxu0 %v1695_v5 }
  0x49   :  { %473 = vmatpush1.msra.mxu0 %v1811_v22  ;;  %604 = vmatprep.subr.mxu1 %v1769_v7 }
  0x4a   :  { %474 = vmatprep.subr.mxu0 %v1815_v23  ;;  %605 = vmatpush1.msra.mxu1 %v1771_v8 }
  0x4b   :  { %475 = vmatpush1.msra.mxu0 %v1819_v24  ;;  %606 = vmatprep.subr.mxu1 %v1778_v10 }
  0x4c   :  { %476 = vmatprep.subr.mxu0 %v1823_v25  ;;  %607 = vmatpush1.msra.mxu1 %v1784_v12 }
  0x4d   :  { %477 = vmatpush1.msra.mxu0 %v1827_v26  ;;  %608 = vmatprep.subr.mxu1 %v1786_v13 }
  0x4e   :  { %609 = vmatpush1.msra.mxu1 %v1792_v15  ;;  %652 = vmatprep.mubr.f32.mxu1 %v1695_v5 }
  0x4f   :  { %610 = vmatprep.subr.mxu1 %v1795_v17  ;;  %746 = vmatprep.subr.mxu0 %v1769_v7 }
  0x50   :  { %611 = vmatpush1.msra.mxu1 %v1798_v18 }
  0x51   :  { %612 = vmatprep.subr.mxu1 %v1801_v19 }
  0x52   :  { %613 = vmatpush1.msra.mxu1 %v1804_v20 }
  0x53   :  { %614 = vmatprep.subr.mxu1 %v1807_v21 }
  0x54   :  { %615 = vmatpush1.msra.mxu1 %v1811_v22 }
  0x55   :  { %616 = vmatprep.subr.mxu1 %v1815_v23 }
  0x56   :  { %617 = vmatpush1.msra.mxu1 %v1819_v24 }
  0x57   :  { %618 = vmatprep.subr.mxu1 %v1823_v25 }
  0x58   :  { %619 = vmatpush1.msra.mxu1 %v1827_v26 }
  0x59   :  { %886 = vmatprep.subr.mxu1 %v1769_v7 }
  0xfd   :  { %v213_v35 = vpop.f32.mrf.mxu0 }
  0xfe   :  { %v214_v36 = vadd.f32 %v213_v35, %v136_v33 }
  0xff   :  { %v215_v37 = vpop.f32.mrf.mxu0 }
 0x100   :  { %218 = vst [vmem:[#allocation3] sm:$0xff] %v214_v36  ;;  %v216_v38 = vadd.f32 %v215_v37, %v140_v34 }
 0x102   :  { %220 = vst.msk [vmem:[#allocation3 + $0x8] sm:$0xff] %vm219_vm1, %v216_v38 }
 0x107   :  { %v364_v47 = vpop.f32.mrf.mxu1 }
 0x109   :  { %v252_v42 = vld [vmem:[#allocation3] ss:$8 sm:$0x3]  ;;  %v254_v43 = vld [vmem:[#allocation3 + $0x7] ss:$8 sm:$0x3]  ;;  %v366_v55 = vpop.f32.mrf.mxu1 }
 0x10a   :  { %v259_v44 = vrot.slane %v252_v42, %v1870_v30  ;;  %v270_v45 = vrot.slane %v254_v43, %v1870_v30  ;;  %v263_v56 = vrot.slane %v252_v42, %v1875_v32  ;;  %v274_v57 = vrot.slane %v254_v43, %v1875_v32  ;;  %v400_v11 = vld [vmem:[#allocation3 + $0x1] ss:$8 sm:$0x3]  ;;  %v402_v14 = vld [vmem:[#allocation3 + $0x6] ss:$8 sm:$0x3] }
 0x10b   :  { %v376_v59 = vadd.f32 %v366_v55, %v1891_v54  ;;  %v407_v16 = vrot.slane %v400_v11, %v1870_v30  ;;  %v411_v37 = vrot.slane %v400_v11, %v1875_v32  ;;  %v422_v38 = vrot.slane %v402_v14, %v1875_v32  ;;  %v544_v52 = vld [vmem:[#allocation3 + $0x5] ss:$8 sm:$0x3] }
 0x10c   :  { %v277_v46 = vsel %vm1880_vm2, %v259_v44, %v270_v45  ;;  %v278_v62 = vsel %vm1895_vm3, %v263_v56, %v274_v57  ;;  %v560_v55 = vrot.slane %v544_v52, %v1870_v30 }
 0x10d   :  { %v369_v48 = vadd.f32 %v364_v47, %v277_v46  ;;  %v426_v43 = vsel %vm1895_vm3, %v411_v37, %v422_v38 }
 0x10f   :  { %v1498_v49 = vmul.f32 -1.442695, %v369_v48 }
 0x111   :  { %1545 = vpow2.f32 %v1498_v49 }
 0x11e   :  { %v1546_v50 = vpop.eup %1545 }
 0x11f   :  { %v373_v51 = vadd.f32 1.0, %v1546_v50 }
 0x121   :  { %1547 = vrcp.f32 %v373_v51  ;;  %v542_v51 = vld [vmem:[#allocation3 + $0x2] ss:$8 sm:$0x3] }
 0x122   :  { %v549_v53 = vrot.slane %v542_v51, %v1870_v30 }
 0x124   :  { %v567_v56 = vsel %vm1880_vm2, %v549_v53, %v560_v55 }
 0x12e   :  { %v1548_v60 = vpop.eup %1547 }
 0x12f   :  { %v377_v61 = vmul.f32 %v1548_v60, %v376_v59 }
 0x131   :  { %v378_v63 = vadd.f32 %v377_v61, %v278_v62 }
 0x133   :  { %1549 = vtanh.f32 %v378_v63 }
 0x140   :  { %v1550_v0 = vpop.eup %1549 }
 0x141   :  { %v380_v1 = vsub.f32 %v1834_v27, %v1550_v0  ;;  %v418_v27 = vrot.slane %v402_v14, %v1870_v30 }
 0x143   :  { %v385_v2 = vrot.slane %v380_v1, %v1870_v30  ;;  %v425_v28 = vsel %vm1880_vm2, %v407_v16, %v418_v27  ;;  %v564_v1 = vrot.slane %v544_v52, %v1875_v32 }
 0x145   :  { %386 = vrot.lane.b32.xlu0 %v385_v2, %s1696_s6 }
 0x1b7   :  { %v387_v3 = vpop.permute.xlu0 %386 }
 0x1b8   :  { %v389_v4 = vmul.f32 %v1548_v60, %v387_v3 }
 0x1ba   :  { %391 = vrot.lane.b32.xlu0 %v389_v4, %s1696_s6 }
 0x22c   :  { %v392_v6 = vpop.permute.xlu0 %391 }
 0x22d   :  { %v394_v9 = vadd.f32 %v1550_v0, %v392_v6  ;;  %v553_v0 = vrot.slane %v542_v51, %v1875_v32 }
 0x22f   :  { %1499 = vmatmul.mubr.msk.f32.vlgmr.msra.gmra.mxu0 %vm219_vm1, %v394_v9  ;;  %396 = vst.msk [vmem:[#allocation10] sm:$0x1] %vm395_vm4, %v394_v9  ;;  %v568_v6 = vsel %vm1895_vm3, %v553_v0, %v564_v1 }
 0x230   :  { %398 = vst.msk [vmem:[#allocation10 + $0x7] sm:$0x1] %vm397_vm5, %v394_v9  ;;  %747 = vmatpush1.msra.mxu0 %v1771_v8  ;;  %794 = vmatprep.mubr.f32.mxu0 %v1695_v5 }
 0x231   :  { %748 = vmatprep.subr.mxu0 %v1778_v10 }
 0x232   :  { %749 = vmatpush1.msra.mxu0 %v1784_v12 }
 0x233   :  { %750 = vmatprep.subr.mxu0 %v1786_v13 }
 0x234   :  { %751 = vmatpush1.msra.mxu0 %v1792_v15 }
 0x235   :  { %752 = vmatprep.subr.mxu0 %v1795_v17 }
 0x236   :  { %753 = vmatpush1.msra.mxu0 %v1798_v18 }
 0x237   :  { %754 = vmatprep.subr.mxu0 %v1801_v19 }
 0x238   :  { %755 = vmatpush1.msra.mxu0 %v1804_v20 }
 0x239   :  { %756 = vmatprep.subr.mxu0 %v1807_v21 }
 0x23a   :  { %757 = vmatpush1.msra.mxu0 %v1811_v22 }
 0x23b   :  { %758 = vmatprep.subr.mxu0 %v1815_v23 }
 0x23c   :  { %759 = vmatpush1.msra.mxu0 %v1819_v24 }
 0x23d   :  { %760 = vmatprep.subr.mxu0 %v1823_v25 }
 0x23e   :  { %761 = vmatpush1.msra.mxu0 %v1827_v26 }
 0x23f   :  { %1026 = vmatprep.subr.mxu0 %v1769_v7 }
 0x2ef   :  { %v512_v29 = vpop.f32.mrf.mxu0 }
 0x2f0   :  { %v517_v31 = vadd.f32 %v512_v29, %v425_v28 }
 0x2f1   :  { %v514_v36 = vpop.f32.mrf.mxu0 }
 0x2f2   :  { %v1500_v33 = vmul.f32 -1.442695, %v517_v31  ;;  %v524_v39 = vadd.f32 %v514_v36, %v1891_v54  ;;  %v684_v31 = vld [vmem:[#allocation3 + $0x3] ss:$8 sm:$0x3] }
 0x2f4   :  { %1551 = vpow2.f32 %v1500_v33  ;;  %v686_v33 = vld [vmem:[#allocation3 + $0x4] ss:$8 sm:$0x3] }
 0x301   :  { %v1552_v34 = vpop.eup %1551 }
 0x302   :  { %v521_v35 = vadd.f32 1.0, %v1552_v34  ;;  %v691_v34 = vrot.slane %v684_v31, %v1870_v30 }
 0x304   :  { %1553 = vrcp.f32 %v521_v35  ;;  %v702_v35 = vrot.slane %v686_v33, %v1870_v30 }
 0x306   :  { %v709_v36 = vsel %vm1880_vm2, %v691_v34, %v702_v35 }
 0x311   :  { %v1554_v40 = vpop.eup %1553 }
 0x312   :  { %v525_v42 = vmul.f32 %v1554_v40, %v524_v39 }
 0x314   :  { %v526_v44 = vadd.f32 %v525_v42, %v426_v43 }
 0x316   :  { %1555 = vtanh.f32 %v526_v44  ;;  %v695_v44 = vrot.slane %v684_v31, %v1875_v32 }
 0x323   :  { %v1556_v45 = vpop.eup %1555 }
 0x324   :  { %v528_v46 = vsub.f32 %v394_v9, %v1556_v45 }
 0x326   :  { %530 = vrot.lane.b32.xlu1 %v528_v46, %s1696_s6 }
 0x398   :  { %v531_v47 = vpop.permute.xlu1 %530 }
 0x399   :  { %v533_v48 = vmul.f32 %v1554_v40, %v531_v47 }
 0x39b   :  { %535 = vrot.lane.b32.xlu1 %v533_v48, %s1696_s6 }
 0x40d   :  { %v536_v49 = vpop.permute.xlu1 %535 }
 0x40e   :  { %v538_v50 = vadd.f32 %v1556_v45, %v536_v49 }
 0x410   :  { %539 = vst.msk [vmem:[#allocation10 + $0x1] sm:$0x1] %vm395_vm4, %v538_v50  ;;  %1501 = vmatmul.mubr.msk.f32.vlgmr.msra.gmra.mxu1 %vm219_vm1, %v538_v50 }
 0x411   :  { %540 = vst.msk [vmem:[#allocation10 + $0x6] sm:$0x1] %vm397_vm5, %v538_v50  ;;  %887 = vmatpush1.msra.mxu1 %v1771_v8  ;;  %934 = vmatprep.mubr.f32.mxu1 %v1695_v5 }
 0x412   :  { %888 = vmatprep.subr.mxu1 %v1778_v10 }
 0x413   :  { %889 = vmatpush1.msra.mxu1 %v1784_v12 }
 0x414   :  { %890 = vmatprep.subr.mxu1 %v1786_v13 }
 0x415   :  { %891 = vmatpush1.msra.mxu1 %v1792_v15 }
 0x416   :  { %892 = vmatprep.subr.mxu1 %v1795_v17 }
 0x417   :  { %893 = vmatpush1.msra.mxu1 %v1798_v18 }
 0x418   :  { %894 = vmatprep.subr.mxu1 %v1801_v19 }
 0x419   :  { %895 = vmatpush1.msra.mxu1 %v1804_v20 }
 0x41a   :  { %896 = vmatprep.subr.mxu1 %v1807_v21 }
 0x41b   :  { %897 = vmatpush1.msra.mxu1 %v1811_v22 }
 0x41c   :  { %898 = vmatprep.subr.mxu1 %v1815_v23 }
 0x41d   :  { %899 = vmatpush1.msra.mxu1 %v1819_v24 }
 0x41e   :  { %900 = vmatprep.subr.mxu1 %v1823_v25 }
 0x41f   :  { %901 = vmatpush1.msra.mxu1 %v1827_v26 }
 0x420   :  { %1166 = vmatprep.subr.mxu1 %v1769_v7 }
 0x4d0   :  { %v654_v57 = vpop.f32.mrf.mxu1 }
 0x4d1   :  { %v659_v59 = vadd.f32 %v654_v57, %v567_v56  ;;  %v825_v57 = vld [vmem:[#allocation3 + $0x4] ss:$8 sm:$0x3] }
 0x4d2   :  { %v656_v63 = vpop.f32.mrf.mxu1 }
 0x4d3   :  { %v1502_v60 = vmul.f32 -1.442695, %v659_v59  ;;  %v666_v2 = vadd.f32 %v656_v63, %v1891_v54  ;;  %v826_v59 = vld [vmem:[#allocation3 + $0x3] ss:$8 sm:$0x3] }
 0x4d5   :  { %1557 = vpow2.f32 %v1502_v60  ;;  %v831_v60 = vrot.slane %v825_v57, %v1870_v30 }
 0x4e2   :  { %v1558_v61 = vpop.eup %1557 }
 0x4e3   :  { %v663_v62 = vadd.f32 1.0, %v1558_v61  ;;  %v842_v61 = vrot.slane %v826_v59, %v1870_v30 }
 0x4e5   :  { %1559 = vrcp.f32 %v663_v62  ;;  %v849_v62 = vsel %vm1880_vm2, %v831_v60, %v842_v61 }
 0x4f2   :  { %v1560_v3 = vpop.eup %1559 }
 0x4f3   :  { %v667_v4 = vmul.f32 %v1560_v3, %v666_v2 }
 0x4f5   :  { %v668_v9 = vadd.f32 %v667_v4, %v568_v6  ;;  %v835_v6 = vrot.slane %v825_v57, %v1875_v32 }
 0x4f7   :  { %1561 = vtanh.f32 %v668_v9  ;;  %v846_v9 = vrot.slane %v826_v59, %v1875_v32 }
 0x504   :  { %v1562_v11 = vpop.eup %1561 }
 0x505   :  { %v670_v14 = vsub.f32 %v538_v50, %v1562_v11 }
 0x507   :  { %672 = vrot.lane.b32.xlu0 %v670_v14, %s1696_s6 }
 0x579   :  { %v673_v16 = vpop.permute.xlu0 %672 }
 0x57a   :  { %v675_v27 = vmul.f32 %v1560_v3, %v673_v16 }
 0x57c   :  { %677 = vrot.lane.b32.xlu1 %v675_v27, %s1696_s6  ;;  %v850_v27 = vsel %vm1895_vm3, %v835_v6, %v846_v9 }
 0x5ee   :  { %v678_v28 = vpop.permute.xlu1 %677 }
 0x5ef   :  { %v680_v29 = vadd.f32 %v1562_v11, %v678_v28 }
 0x5f1   :  { %681 = vst.msk [vmem:[#allocation10 + $0x2] sm:$0x1] %vm395_vm4, %v680_v29  ;;  %1503 = vmatmul.mubr.msk.f32.vlgmr.msra.gmra.mxu0 %vm219_vm1, %v680_v29 }
 0x5f2   :  { %682 = vst.msk [vmem:[#allocation10 + $0x5] sm:$0x1] %vm397_vm5, %v680_v29  ;;  %1027 = vmatpush1.msra.mxu0 %v1771_v8  ;;  %1074 = vmatprep.mubr.f32.mxu0 %v1695_v5 }
 0x5f3   :  { %1028 = vmatprep.subr.mxu0 %v1778_v10 }
 0x5f4   :  { %1029 = vmatpush1.msra.mxu0 %v1784_v12 }
 0x5f5   :  { %1030 = vmatprep.subr.mxu0 %v1786_v13 }
 0x5f6   :  { %1031 = vmatpush1.msra.mxu0 %v1792_v15 }
 0x5f7   :  { %1032 = vmatprep.subr.mxu0 %v1795_v17 }
 0x5f8   :  { %1033 = vmatpush1.msra.mxu0 %v1798_v18 }
 0x5f9   :  { %1034 = vmatprep.subr.mxu0 %v1801_v19 }
 0x5fa   :  { %1035 = vmatpush1.msra.mxu0 %v1804_v20 }
 0x5fb   :  { %1036 = vmatprep.subr.mxu0 %v1807_v21 }
 0x5fc   :  { %1037 = vmatpush1.msra.mxu0 %v1811_v22 }
 0x5fd   :  { %1038 = vmatprep.subr.mxu0 %v1815_v23 }
 0x5fe   :  { %1039 = vmatpush1.msra.mxu0 %v1819_v24 }
 0x5ff   :  { %1040 = vmatprep.subr.mxu0 %v1823_v25 }
 0x600   :  { %1041 = vmatpush1.msra.mxu0 %v1827_v26 }
 0x601   :  { %1306 = vmatprep.subr.mxu0 %v1769_v7  ;;  %v706_v7 = vrot.slane %v686_v33, %v1875_v32 }
 0x603   :  { %v710_v48 = vsel %vm1895_vm3, %v695_v44, %v706_v7 }
 0x6b1   :  { %v796_v37 = vpop.f32.mrf.mxu0 }
 0x6b2   :  { %v801_v38 = vadd.f32 %v796_v37, %v709_v36 }
 0x6b3   :  { %v798_v43 = vpop.f32.mrf.mxu0 }
 0x6b4   :  { %v1504_v39 = vmul.f32 -1.442695, %v801_v38  ;;  %v808_v45 = vadd.f32 %v798_v43, %v1891_v54 }
 0x6b6   :  { %1563 = vpow2.f32 %v1504_v39 }
 0x6c3   :  { %v1564_v40 = vpop.eup %1563 }
 0x6c4   :  { %v805_v42 = vadd.f32 1.0, %v1564_v40 }
 0x6c6   :  { %1565 = vrcp.f32 %v805_v42 }
 0x6d3   :  { %v1566_v46 = vpop.eup %1565 }
 0x6d4   :  { %v809_v47 = vmul.f32 %v1566_v46, %v808_v45  ;;  %v1105_v45 = vld [vmem:[#allocation3 + $0x6] ss:$8 sm:$0x3] }
 0x6d5   :  { %v1115_v57 = vrot.slane %v1105_v45, %v1875_v32 }
 0x6d6   :  { %v810_v49 = vadd.f32 %v809_v47, %v710_v48  ;;  %v1111_v47 = vrot.slane %v1105_v45, %v1870_v30 }
 0x6d8   :  { %1567 = vtanh.f32 %v810_v49 }
 0x6e5   :  { %v1568_v50 = vpop.eup %1567 }
 0x6e6   :  { %v812_v51 = vsub.f32 %v680_v29, %v1568_v50 }
 0x6e8   :  { %814 = vrot.lane.b32.xlu0 %v812_v51, %s1696_s6 }
 0x75a   :  { %v815_v52 = vpop.permute.xlu0 %814 }
 0x75b   :  { %v817_v53 = vmul.f32 %v1566_v46, %v815_v52  ;;  %v1106_v46 = vld [vmem:[#allocation3 + $0x1] ss:$8 sm:$0x3] }
 0x75c   :  { %v1122_v48 = vrot.slane %v1106_v46, %v1870_v30  ;;  %v1126_v59 = vrot.slane %v1106_v46, %v1875_v32 }
 0x75d   :  { %819 = vrot.lane.b32.xlu1 %v817_v53, %s1696_s6 }
 0x75e   :  { %v1129_v49 = vsel %vm1880_vm2, %v1111_v47, %v1122_v48 }
 0x7cf   :  { %v820_v55 = vpop.permute.xlu1 %819 }
 0x7d0   :  { %v822_v56 = vadd.f32 %v1568_v50, %v820_v55 }
 0x7d2   :  { %823 = vst.msk [vmem:[#allocation10 + $0x3] sm:$0x1] %vm395_vm4, %v822_v56  ;;  %1505 = vmatmul.mubr.msk.f32.vlgmr.msra.gmra.mxu1 %vm219_vm1, %v822_v56 }
 0x7d3   :  { %824 = vst.msk [vmem:[#allocation10 + $0x4] sm:$0x1] %vm397_vm5, %v822_v56  ;;  %1167 = vmatpush1.msra.mxu1 %v1771_v8  ;;  %1214 = vmatprep.mubr.f32.mxu1 %v1695_v5 }
 0x7d4   :  { %1168 = vmatprep.subr.mxu1 %v1778_v10 }
 0x7d5   :  { %1169 = vmatpush1.msra.mxu1 %v1784_v12 }
 0x7d6   :  { %1170 = vmatprep.subr.mxu1 %v1786_v13 }
 0x7d7   :  { %1171 = vmatpush1.msra.mxu1 %v1792_v15 }
 0x7d8   :  { %1172 = vmatprep.subr.mxu1 %v1795_v17 }
 0x7d9   :  { %1173 = vmatpush1.msra.mxu1 %v1798_v18 }
 0x7da   :  { %1174 = vmatprep.subr.mxu1 %v1801_v19 }
 0x7db   :  { %1175 = vmatpush1.msra.mxu1 %v1804_v20 }
 0x7dc   :  { %1176 = vmatprep.subr.mxu1 %v1807_v21 }
 0x7dd   :  { %1177 = vmatpush1.msra.mxu1 %v1811_v22 }
 0x7de   :  { %1178 = vmatprep.subr.mxu1 %v1815_v23 }
 0x7df   :  { %1179 = vmatpush1.msra.mxu1 %v1819_v24 }
 0x7e0   :  { %1180 = vmatprep.subr.mxu1 %v1823_v25 }
 0x7e1   :  { %1181 = vmatpush1.msra.mxu1 %v1827_v26 }
 0x892   :  { %v936_v63 = vpop.f32.mrf.mxu1 }
 0x893   :  { %v941_v0 = vadd.f32 %v936_v63, %v849_v62  ;;  %v1130_v63 = vsel %vm1895_vm3, %v1115_v57, %v1126_v59 }
 0x894   :  { %v938_v4 = vpop.f32.mrf.mxu1 }
 0x895   :  { %v1506_v1 = vmul.f32 -1.442695, %v941_v0  ;;  %v948_v11 = vadd.f32 %v938_v4, %v1891_v54 }
 0x897   :  { %1569 = vpow2.f32 %v1506_v1 }
 0x8a4   :  { %v1570_v2 = vpop.eup %1569 }
 0x8a5   :  { %v945_v3 = vadd.f32 1.0, %v1570_v2 }
 0x8a7   :  { %1571 = vrcp.f32 %v945_v3 }
 0x8b4   :  { %v1572_v14 = vpop.eup %1571 }
 0x8b5   :  { %v949_v16 = vmul.f32 %v1572_v14, %v948_v11  ;;  %v1245_v11 = vld [vmem:[#allocation3 + $0x7] ss:$8 sm:$0x3] }
 0x8b7   :  { %v950_v28 = vadd.f32 %v949_v16, %v850_v27  ;;  %v1251_v16 = vrot.slane %v1245_v11, %v1870_v30 }
 0x8b9   :  { %1573 = vtanh.f32 %v950_v28 }
 0x8c6   :  { %v1574_v29 = vpop.eup %1573 }
 0x8c7   :  { %v952_v31 = vsub.f32 %v822_v56, %v1574_v29 }
 0x8c9   :  { %954 = vrot.lane.b32.xlu0 %v952_v31, %s1696_s6 }
 0x93b   :  { %v955_v33 = vpop.permute.xlu0 %954 }
 0x93c   :  { %v957_v34 = vmul.f32 %v1572_v14, %v955_v33  ;;  %v1246_v14 = vld [vmem:[#allocation3] ss:$8 sm:$0x3] }
 0x93d   :  { %v1262_v27 = vrot.slane %v1246_v14, %v1870_v30 }
 0x93e   :  { %959 = vrot.lane.b32.xlu1 %v957_v34, %s1696_s6 }
 0x93f   :  { %v1269_v28 = vsel %vm1880_vm2, %v1251_v16, %v1262_v27 }
 0x9b0   :  { %v960_v35 = vpop.permute.xlu1 %959 }
 0x9b1   :  { %v962_v36 = vadd.f32 %v1574_v29, %v960_v35 }
 0x9b3   :  { %963 = vst.msk [vmem:[#allocation10 + $0x4] sm:$0x1] %vm395_vm4, %v962_v36  ;;  %1507 = vmatmul.mubr.msk.f32.vlgmr.msra.gmra.mxu0 %vm219_vm1, %v962_v36 }
 0x9b4   :  { %964 = vst.msk [vmem:[#allocation10 + $0x3] sm:$0x1] %vm397_vm5, %v962_v36  ;;  %1307 = vmatpush1.msra.mxu0 %v1771_v8  ;;  %1354 = vmatprep.mubr.f32.mxu0 %v1695_v5  ;;  %v965_v5 = vld [vmem:[#allocation3 + $0x5] ss:$8 sm:$0x3] }
 0x9b5   :  { %1308 = vmatprep.subr.mxu0 %v1778_v10  ;;  %v966_v8 = vld [vmem:[#allocation3 + $0x2] ss:$8 sm:$0x3]  ;;  %v971_v10 = vrot.slane %v965_v5, %v1870_v30 }
 0x9b6   :  { %1309 = vmatpush1.msra.mxu0 %v1784_v12  ;;  %v982_v12 = vrot.slane %v966_v8, %v1870_v30 }
 0x9b7   :  { %1310 = vmatprep.subr.mxu0 %v1786_v13 }
 0x9b8   :  { %1311 = vmatpush1.msra.mxu0 %v1792_v15  ;;  %v989_v13 = vsel %vm1880_vm2, %v971_v10, %v982_v12 }
 0x9b9   :  { %1312 = vmatprep.subr.mxu0 %v1795_v17 }
 0x9ba   :  { %1313 = vmatpush1.msra.mxu0 %v1798_v18 }
 0x9bb   :  { %1314 = vmatprep.subr.mxu0 %v1801_v19 }
 0x9bc   :  { %1315 = vmatpush1.msra.mxu0 %v1804_v20 }
 0x9bd   :  { %1316 = vmatprep.subr.mxu0 %v1807_v21 }
 0x9be   :  { %1317 = vmatpush1.msra.mxu0 %v1811_v22  ;;  %v975_v22 = vrot.slane %v965_v5, %v1875_v32  ;;  %v1255_v5 = vrot.slane %v1245_v11, %v1875_v32 }
 0x9bf   :  { %1318 = vmatprep.subr.mxu0 %v1815_v23  ;;  %v986_v23 = vrot.slane %v966_v8, %v1875_v32  ;;  %v1266_v8 = vrot.slane %v1246_v14, %v1875_v32 }
 0x9c0   :  { %1319 = vmatpush1.msra.mxu0 %v1819_v24 }
 0x9c1   :  { %1320 = vmatprep.subr.mxu0 %v1823_v25  ;;  %v990_v37 = vsel %vm1895_vm3, %v975_v22, %v986_v23  ;;  %v1270_v30 = vsel %vm1895_vm3, %v1255_v5, %v1266_v8 }
 0x9c2   :  { %1321 = vmatpush1.msra.mxu0 %v1827_v26 }
 0xa73   :  { %v1076_v15 = vpop.f32.mrf.mxu0 }
 0xa74   :  { %v1081_v17 = vadd.f32 %v1076_v15, %v989_v13 }
 0xa75   :  { %v1078_v21 = vpop.f32.mrf.mxu0 }
 0xa76   :  { %v1508_v18 = vmul.f32 -1.442695, %v1081_v17  ;;  %v1088_v24 = vadd.f32 %v1078_v21, %v1891_v54 }
 0xa78   :  { %1575 = vpow2.f32 %v1508_v18 }
 0xa85   :  { %v1576_v19 = vpop.eup %1575 }
 0xa86   :  { %v1085_v20 = vadd.f32 1.0, %v1576_v19 }
 0xa88   :  { %1577 = vrcp.f32 %v1085_v20 }
 0xa95   :  { %v1578_v25 = vpop.eup %1577 }
 0xa96   :  { %v1089_v26 = vmul.f32 %v1578_v25, %v1088_v24 }
 0xa98   :  { %v1090_v38 = vadd.f32 %v1089_v26, %v990_v37 }
 0xa9a   :  { %1579 = vtanh.f32 %v1090_v38 }
 0xaa7   :  { %v1580_v39 = vpop.eup %1579 }
 0xaa8   :  { %v1092_v40 = vsub.f32 %v962_v36, %v1580_v39 }
 0xaaa   :  { %1094 = vrot.lane.b32.xlu0 %v1092_v40, %s1696_s6 }
 0xb1c   :  { %v1095_v42 = vpop.permute.xlu0 %1094 }
 0xb1d   :  { %v1097_v43 = vmul.f32 %v1578_v25, %v1095_v42 }
 0xb1f   :  { %1099 = vrot.lane.b32.xlu1 %v1097_v43, %s1696_s6 }
 0xb91   :  { %v1100_v44 = vpop.permute.xlu1 %1099 }
 0xb92   :  { %v1102_v7 = vadd.f32 %v1580_v39, %v1100_v44 }
 0xb94   :  { %1103 = vst.msk [vmem:[#allocation10 + $0x5] sm:$0x1] %vm395_vm4, %v1102_v7  ;;  %1509 = vmatmul.mubr.msk.f32.vlgmr.msra.gmra.mxu1 %vm219_vm1, %v1102_v7 }
 0xb95   :  { %1104 = vst.msk [vmem:[#allocation10 + $0x2] sm:$0x1] %vm397_vm5, %v1102_v7 }
 0xc54   :  { %v1216_v50 = vpop.f32.mrf.mxu1 }
 0xc55   :  { %v1221_v51 = vadd.f32 %v1216_v50, %v1129_v49 }
 0xc56   :  { %v1218_v56 = vpop.f32.mrf.mxu1 }
 0xc57   :  { %v1510_v52 = vmul.f32 -1.442695, %v1221_v51  ;;  %v1228_v60 = vadd.f32 %v1218_v56, %v1891_v54 }
 0xc59   :  { %1581 = vpow2.f32 %v1510_v52 }
 0xc66   :  { %v1582_v53 = vpop.eup %1581 }
 0xc67   :  { %v1225_v55 = vadd.f32 1.0, %v1582_v53 }
 0xc69   :  { %1583 = vrcp.f32 %v1225_v55 }
 0xc76   :  { %v1584_v61 = vpop.eup %1583 }
 0xc77   :  { %v1229_v62 = vmul.f32 %v1584_v61, %v1228_v60 }
 0xc79   :  { %v1230_v0 = vadd.f32 %v1229_v62, %v1130_v63 }
 0xc7b   :  { %1585 = vtanh.f32 %v1230_v0 }
 0xc88   :  { %v1586_v1 = vpop.eup %1585 }
 0xc89   :  { %v1232_v2 = vsub.f32 %v1102_v7, %v1586_v1 }
 0xc8b   :  { %1234 = vrot.lane.b32.xlu0 %v1232_v2, %s1696_s6 }
 0xcfd   :  { %v1235_v3 = vpop.permute.xlu0 %1234 }
 0xcfe   :  { %v1237_v4 = vmul.f32 %v1584_v61, %v1235_v3 }
 0xd00   :  { %1239 = vrot.lane.b32.xlu1 %v1237_v4, %s1696_s6 }
 0xd72   :  { %v1240_v6 = vpop.permute.xlu1 %1239 }
 0xd73   :  { %v1242_v9 = vadd.f32 %v1586_v1, %v1240_v6 }
 0xd75   :  { %1243 = vst.msk [vmem:[#allocation10 + $0x6] sm:$0x1] %vm395_vm4, %v1242_v9  ;;  %1511 = vmatmul.mubr.msk.f32.vlgmr.msra.gmra.mxu0 %vm219_vm1, %v1242_v9 }
 0xd76   :  { %1244 = vst.msk [vmem:[#allocation10 + $0x1] sm:$0x1] %vm397_vm5, %v1242_v9 }
 0xe35   :  { %v1356_v29 = vpop.f32.mrf.mxu0 }
 0xe36   :  { %v1361_v31 = vadd.f32 %v1356_v29, %v1269_v28 }
 0xe37   :  { %v1358_v36 = vpop.f32.mrf.mxu0 }
 0xe38   :  { %v1512_v33 = vmul.f32 -1.442695, %v1361_v31  ;;  %v1368_v10 = vadd.f32 %v1358_v36, %v1891_v54 }
 0xe3a   :  { %1587 = vpow2.f32 %v1512_v33 }
 0xe47   :  { %v1588_v34 = vpop.eup %1587 }
 0xe48   :  { %v1365_v35 = vadd.f32 1.0, %v1588_v34 }
 0xe4a   :  { %1589 = vrcp.f32 %v1365_v35 }
 0xe57   :  { %v1590_v12 = vpop.eup %1589 }
 0xe58   :  { %v1369_v13 = vmul.f32 %v1590_v12, %v1368_v10 }
 0xe5a   :  { %v1370_v41 = vadd.f32 %v1369_v13, %v1270_v30 }
 0xe5c   :  { %1591 = vtanh.f32 %v1370_v41 }
 0xe69   :  { %v1592_v15 = vpop.eup %1591 }
 0xe6a   :  { %v1372_v17 = vsub.f32 %v1242_v9, %v1592_v15 }
 0xe6c   :  { %1374 = vrot.lane.b32.xlu0 %v1372_v17, %s1696_s6 }
 0xede   :  { %v1375_v18 = vpop.permute.xlu0 %1374 }
 0xedf   :  { %v1377_v19 = vmul.f32 %v1590_v12, %v1375_v18 }
 0xee1   :  { %1379 = vrot.lane.b32.xlu1 %v1377_v19, %s1696_s6 }
 0xf53   :  { %v1380_v32 = vpop.permute.xlu1 %1379 }
 0xf54   :  { %v1382_v54 = vadd.f32 %v1592_v15, %v1380_v32 }
 0xf56   :  { %1383 = vst.msk [vmem:[#allocation10 + $0x7] sm:$0x1] %vm395_vm4, %v1382_v54 }
 0xf57   :  { %1384 = vst.msk [vmem:[#allocation10] sm:$0x1] %vm397_vm5, %v1382_v54 }
 0xf58   :  { %1386 = vst.msk [vmem:[#allocation11] sm:$0x1] %vm1385_vm6, %v1382_v54 }
 0xf59   :  { %1636 = shalt.err (!%p1633_p2)
}
 0xf5a   :  { %1396 = dma.vmem_to_hbm [thread:$0]  %s1394_s20, 128, %s2102_s7, [#allocation7]  }
 0xf5b   :  { %s1645_s25 = scalar_lea.vmem %s1404_s22, 16  ;;  %s1649_s26 = scalar_lea.vmem %s1404_s22, 32 }
 0xf5c   :  { %p1646_p3 = scmp.ne.s32.totalorder %s1404_s22, %s1645_s25  ;;  %p1650_p4 = scmp.lt.s32.totalorder %s1404_s22, %s1404_s22 }
 0xf5d   :  { %p1651_p5 = scmp.lt.s32.totalorder %s1649_s26, %s1645_s25 }
 0xf5f   :  { %p1652_p6 = por %p1651_p5, %p1650_p4 }
 0xf61   :  { %p1653_p7 = pnand %p1652_p6, %p1646_p3 }
 0xf63   :  { %1656 = shalt.err (!%p1653_p7)
}
 0xf64   :  { %1406 = dma.vmem_to_hbm [thread:$0]  %s1404_s22, 16, %s2103_s8, [#allocation12]  }
 0xf65   :  { %1679 = dma.done.wait [#allocation7], 128  }
 0xf66   :  { %1680 = vsyncadd [#allocation7], 4294967168 }
 0xf67   :  { %1681 = dma.done.wait [#allocation12], 16  }
 0xf68   :  { %1682 = vsyncadd [#allocation12], 4294967280 }
 0xf69   :  { %1413 = vsyncpa [#allocation6], 1 }
 0xf6a   :  { %1414 = vsyncpa [#allocation7], 1 }
 0xf6b   :  { %1415 = vsyncpa [#allocation12], 1 }
 0xf6c   :  { %1416 = vsyncpa [#allocation8], 1 }
 0xf6d   :  { %1417 = vsyncmov [#allocation4] }
 0xf70   :  { %s1418_s7 = vpop.sfrf %1417 }
 0xf71   :  { %p1513_p8 = scmp.ne.s32.totalorder %s1418_s7, 0 }
 0xf73   :  { %1422 = shalt.err (%p1513_p8)  }
 0xf74   :  { %1424 = vsyncmov [#allocation4 + $0x1] }
 0xf77   :  { %s1425_s1 = vpop.sfrf %1424 }
 0xf78   :  { %p1514_p9 = scmp.ne.s32.totalorder %s1425_s1, 0 }
 0xf7a   :  { %1429 = shalt.err (%p1514_p9)  }
 0xf7b   :  { %1431 = vsyncmov [#allocation4 + $0x2] }
 0xf7e   :  { %s1432_s29 = vpop.sfrf %1431 }
 0xf7f   :  { %p1515_p10 = scmp.ne.s32.totalorder %s1432_s29, 0 }
 0xf81   :  { %1436 = shalt.err (%p1515_p10)  }
 0xf82   :  { %1438 = vsyncmov [#allocation4 + $0x3] }
 0xf85   :  { %s1439_s8 = vpop.sfrf %1438 }
 0xf86   :  { %p1516_p11 = scmp.ne.s32.totalorder %s1439_s8, 0 }
 0xf88   :  { %1443 = shalt.err (%p1516_p11)  }
 0xf89   :  { %1445 = vsyncmov [#allocation4 + $0x4] }
 0xf8c   :  { %s1446_s30 = vpop.sfrf %1445 }
 0xf8d   :  { %p1517_p12 = scmp.ne.s32.totalorder %s1446_s30, 0 }
 0xf8f   :  { %1450 = shalt.err (%p1517_p12)  }
 0xf90   :  { %1452 = vsyncmov [#allocation4 + $0x5] }
 0xf93   :  { %s1453_s9 = vpop.sfrf %1452 }
 0xf94   :  { %p1518_p13 = scmp.ne.s32.totalorder %s1453_s9, 0 }
 0xf96   :  { %1457 = shalt.err (%p1518_p13)  }
 0xf97   :  { %1459 = vsyncmov [#allocation4 + $0x6] }
 0xf9a   :  { %s1460_s10 = vpop.sfrf %1459 }
 0xf9b   :  { %p1519_p0 = scmp.ne.s32.totalorder %s1460_s10, 0 }
 0xf9d   :  { %1464 = shalt.err (%p1519_p0)  }
 0xf9e   :  { %1466 = vsyncmov [#allocation4 + $0x7] }
 0xfa1   :  { %s1467_s11 = vpop.sfrf %1466 }
 0xfa2   :  { %p1520_p1 = scmp.ne.s32.totalorder %s1467_s11, 0 }
 0xfa4   :  { %1471 = shalt.err (%p1520_p1)  }

</bundles_post_ra>
